<compile_context>
chip_gen: v6e
topology: v6e:2x2x1
jax: 0.10.0
libtpu: 0.0.40
codegen_flags: <defaults>
</compile_context>

<pallas_src>
import functools

import jax
import jax.numpy as jnp
from jax import lax
from jax.experimental import pallas as pl
from jax.experimental.pallas import tpu as pltpu


def _conv_ltc_kernel(x_ref, w_ref, p_ref, o_ref, t_ref, a_ref, c_ref, *, s_blk):
    sc = pl.program_id(1)
    cout, hw = t_ref.shape

    # Hidden state is carried across S-chunks in tanh-form T, where v = 0.5*T+0.5.
    # v_pre = 0 at the start of every sequence  <=>  T = -1.
    @pl.when(sc == 0)
    def _():
        t_ref[...] = jnp.full_like(t_ref, -1.0)

    # Per-channel params: load + lane-broadcast ONCE per grid step (never in loops).
    cm      = jnp.broadcast_to(p_ref[0], (cout, hw))
    vleak   = jnp.broadcast_to(p_ref[1], (cout, hw))
    tau_m   = jnp.broadcast_to(p_ref[2], (cout, hw))
    e_rev   = jnp.broadcast_to(p_ref[3], (cout, hw))
    bn_bias = jnp.broadcast_to(p_ref[4], (cout, hw))

    w = w_ref[...]                 # (Cout, CK) bf16; constant index_map -> resident

    # ---------------- Phase 1: timestep-independent gate precompute ----------------
    #   wih_t = conv_t + bn_bias                       (eval-BN scale folded into w)
    #   a_t   = tau_m / (vleak + cm * sigmoid(wih_t))
    #   b_t   = wih_t * E_revin
    # Recurrence  v_t = sigmoid(a_t*v_{t-1} + b_t),  sigmoid(x) = 0.5*tanh(x/2)+0.5,
    # rewritten over T_t = tanh(.)  (v_t = 0.5*T_t + 0.5):
    #   T_t = tanh(A_t*T_{t-1} + C_t),   A_t = 0.25*a_t,   C_t = 0.25*a_t + 0.5*b_t
    # so only mul + add + tanh remain on the serial chain in phase 2.
    # The reference's '/(1 + 1e-8)' on the numerator is an exact identity in f32.
    def precompute(t, carry):
        conv = jnp.dot(w, x_ref[0, t],
                       preferred_element_type=jnp.float32)        # (Cout, HW), MXU
        wih = conv + bn_bias
        sig = 0.5 * jnp.tanh(0.5 * wih) + 0.5      # sigmoid as one EUP op
        a25 = 0.25 * (tau_m / (vleak + cm * sig))
        a_ref[t] = a25
        c_ref[t] = a25 + 0.5 * (wih * e_rev)
        return carry

    lax.fori_loop(0, s_blk, precompute, 0, unroll=True)

    # ---------------- Phase 2: minimal sequential LTC recurrence ----------------
    def step(t, t_prev):
        t_new = jnp.tanh(a_ref[t] * t_prev + c_ref[t])
        o_ref[0, t] = 0.5 * t_new + 0.5            # stream_opt=True: emit every step
        return t_new

    t_final = lax.fori_loop(0, s_blk, step, t_ref[...], unroll=True)
    t_ref[...] = t_final                           # carry hidden state to next chunk


def _pick_s_block(S, CK, Cout, HW, budget_bytes=24 << 20, cap=8):
    # per timestep: double-buffered bf16 x block + double-buffered f32 out block
    #             + f32 A/C gate scratch
    per_step = 2 * CK * HW * 2 + 2 * Cout * HW * 4 + 2 * Cout * HW * 4
    cap = max(1, min(S, cap, budget_bytes // max(per_step, 1)))
    for d in range(int(cap), 0, -1):
        if S % d == 0:
            return d
    return 1


def conv_ltc_forward(x, w, params):
    """x: (B, S, Cin, H, W) f32, w: (Cout, Cin, 3, 3) f32, params: (6, Cout) f32."""
    B, S, Cin, H, W = x.shape
    Cout = w.shape[0]
    K = 3
    HW = H * W
    CK = Cin * K * K

    # ---- im2col (plain-JAX layout glue; conv FLOPs happen in the kernel) ----
    # Cast to bf16 first so the 9x-inflated im2col stream is half-width in HBM.
    # TODO(synk): for large problems on low-BW parts (v5e), build the 9 shifted
    # views in-kernel from the raw (Cin, H, W) tile instead of materializing the
    # 9x-inflated im2col in HBM.
    x_bf = x.astype(jnp.bfloat16)
    x_pad = jnp.pad(x_bf, ((0, 0), (0, 0), (0, 0), (1, 1), (1, 1)))
    patches = [x_pad[:, :, :, dy:dy + H, dx:dx + W]
               for dy in range(K) for dx in range(K)]              # 9 x (B,S,Cin,H,W)
    x_col = jnp.stack(patches, axis=3)                             # (B,S,Cin,9,H,W)
    x_col = x_col.reshape(B, S, CK, HW)                            # index = ci*9 + dy*3 + dx

    cm, vleak, tau_m, e_rev, bn_scale, bn_bias = (params[i] for i in range(6))
    # Fold the eval-mode BatchNorm scale into the conv weights (same (ci,dy,dx)
    # flattening as x_col); the bias is added in-kernel.
    w_col = (w.reshape(Cout, CK) * bn_scale[:, None]).astype(jnp.bfloat16)
    p5 = jnp.stack([cm, vleak, tau_m, e_rev, bn_bias], axis=0).reshape(5, Cout, 1)

    s_blk = _pick_s_block(S, CK, Cout, HW)
    num_chunks = S // s_blk

    # Explicit VMEM budget (portable to v7x's 64 MiB VMEM; generous headroom).
    vmem_need = (2 * s_blk * CK * HW * 2          # x blocks (bf16, double-buffered)
                 + 2 * s_blk * Cout * HW * 4      # out blocks (f32, double-buffered)
                 + 2 * s_blk * Cout * HW * 4      # A/C gate scratch (f32)
                 + 2 * Cout * CK * 2              # weights
                 + 5 * Cout * 128 * 4             # params (lane-padded)
                 + Cout * HW * 4)                 # hidden-state scratch
    vmem_limit = int(min(max(2 * vmem_need, 8 << 20), 32 << 20))

    kernel = functools.partial(_conv_ltc_kernel, s_blk=s_blk)

    out = pl.pallas_call(
        kernel,
        out_shape=jax.ShapeDtypeStruct((B, S, Cout, HW), jnp.float32),
        grid_spec=pltpu.PrefetchScalarGridSpec(
            num_scalar_prefetch=0,
            grid=(B, num_chunks),
            in_specs=[
                pl.BlockSpec((1, s_blk, CK, HW), lambda b, sc: (b, sc, 0, 0)),
                pl.BlockSpec((Cout, CK), lambda b, sc: (0, 0)),
                pl.BlockSpec((5, Cout, 1), lambda b, sc: (0, 0, 0)),
            ],
            out_specs=pl.BlockSpec((1, s_blk, Cout, HW), lambda b, sc: (b, sc, 0, 0)),
            scratch_shapes=[
                pltpu.VMEM((Cout, HW), jnp.float32),          # hidden state (tanh-form)
                pltpu.VMEM((s_blk, Cout, HW), jnp.float32),   # A_t gate scratch
                pltpu.VMEM((s_blk, Cout, HW), jnp.float32),   # C_t gate scratch
            ],
        ),
        compiler_params=pltpu.CompilerParams(
            dimension_semantics=("parallel", "arbitrary"),
            vmem_limit_bytes=vmem_limit),
    )(x_col, w_col, p5)

    return out.reshape(B, S, Cout, H, W)


def conv_ltc_reference(x, w, params):
    """Pure-JAX reference mirroring the PyTorch forward (eval-mode BN)."""
    B, S, Cin, H, W = x.shape
    Cout = w.shape[0]
    cm, vleak, tau_m, e_rev, bn_scale, bn_bias = [
        params[i].reshape(1, Cout, 1, 1) for i in range(6)]
    v_pre = jnp.zeros((B, Cout, H, W), jnp.float32)
    outs = []
    for t in range(S):
        conv = jax.lax.conv_general_dilated(
            x[:, t], w, window_strides=(1, 1), padding=((1, 1), (1, 1)),
            dimension_numbers=('NCHW', 'OIHW', 'NCHW'),
            precision=jax.lax.Precision.HIGHEST)
        wih = conv * bn_scale + bn_bias
        num = tau_m * v_pre / (vleak + cm * jax.nn.sigmoid(wih)) + wih * e_rev
        v_pre = jax.nn.sigmoid(num / (1.0 + 1e-8))
        outs.append(v_pre)
    return jnp.stack(outs, axis=1)


if __name__ == "__main__":
    # stream_opt's final reshape in the PyTorch module implies Cout == Cin.
    # S=16 with S_BLK=8 exercises the in-chunk loop, the cross-chunk hidden-state
    # carry, and the sc==0 reset for the second batch element.
    B, S, Cin, Cout, H, W = 2, 16, 8, 8, 16, 16

    key = jax.random.PRNGKey(0)
    k_x, k_w, k_cm, k_vl, k_tau, k_er = jax.random.split(key, 6)

    x = jax.random.normal(k_x, (B, S, Cin, H, W), jnp.float32)

    # conv weight: xavier_normal_ (gain=1)
    fan_in, fan_out = Cin * 9, Cout * 9
    std = (2.0 / (fan_in + fan_out)) ** 0.5
    w = std * jax.random.normal(k_w, (Cout, Cin, 3, 3), jnp.float32)

    cm = 1.0 + 0.1 * jax.random.normal(k_cm, (Cout,), jnp.float32)
    vleak = 1.0 + 0.1 * jax.random.normal(k_vl, (Cout,), jnp.float32)
    tau_m = 0.8 + (0.5 - 0.8) * jax.random.uniform(k_tau, (Cout,), jnp.float32)
    e_rev = 1.0 + 0.1 * jax.random.normal(k_er, (Cout,), jnp.float32)

    # BatchNorm2d at init, eval-mode: gamma=1, beta=0, running_mean=0, running_var=1.
    # TODO(synk): training-mode BatchNorm (per-timestep batch statistics) not implemented.
    bn_eps = 1e-5
    bn_scale = jnp.full((Cout,), 1.0 / (1.0 + bn_eps) ** 0.5, jnp.float32)
    bn_bias = jnp.zeros((Cout,), jnp.float32)

    params = jnp.stack([cm, vleak, tau_m, e_rev, bn_scale, bn_bias], axis=0)

    out = jax.jit(conv_ltc_forward)(x, w, params)
    out = jax.block_until_ready(out)
    assert out.shape == (B, S, Cout, H, W)

    ref = conv_ltc_reference(x, w, params)
    err = float(jnp.max(jnp.abs(out - ref)))
    assert err < 5e-2, f"max abs error {err}"

    print("KERNEL_OK")
</pallas_src>

<mosaic_0001>
module attributes {stable_mosaic.version = 11 : i64} {
  func.func @_conv_ltc_kernel(%arg0: i32, %arg1: i32, %arg2: memref<1x8x72x256xbf16, #tpu.memory_space<vmem>>, %arg3: memref<8x72xbf16, #tpu.memory_space<vmem>>, %arg4: memref<5x8x1xf32, #tpu.memory_space<vmem>>, %arg5: memref<1x8x8x256xf32, #tpu.memory_space<vmem>>, %arg6: memref<8x256xf32, #tpu.memory_space<vmem>>, %arg7: memref<8x8x256xf32, #tpu.memory_space<vmem>>, %arg8: memref<8x8x256xf32, #tpu.memory_space<vmem>>) attributes {dimension_semantics = [#tpu.dimension_semantics<parallel>, #tpu.dimension_semantics<arbitrary>], iteration_bounds = array<i64: 2, 2>, scalar_prefetch = 0 : i64, scratch_operands = 3 : i64, tpu.core_type = #tpu.core_type<tc>, window_params = [{transform_indices = @transform_0, window_bounds = array<i64: 1, 8, 72, 256>}, {pipeline_mode = #tpu.pipeline_mode<synchronous>, transform_indices = @transform_1, window_bounds = array<i64: 8, 72>}, {pipeline_mode = #tpu.pipeline_mode<synchronous>, transform_indices = @transform_2, window_bounds = array<i64: 5, 8, 1>}, {transform_indices = @transform_3, window_bounds = array<i64: 1, 8, 8, 256>}]} {
    %c0_i32 = arith.constant 0 : i32
    %0 = arith.cmpi eq, %arg1, %c0_i32 : i32
    %1 = arith.extui %0 : i1 to i32
    %c0_i32_0 = arith.constant 0 : i32
    %2 = arith.cmpi ne, %1, %c0_i32_0 : i32
    scf.if %2 {
      %cst_202 = arith.constant -1.000000e+00 : f32
      %394 = vector.broadcast %cst_202 : f32 to vector<8x256xf32>
      %c0_203 = arith.constant 0 : index
      %c0_204 = arith.constant 0 : index
      %395 = vector.load %arg6[%c0_203, %c0_204] : memref<8x256xf32, #tpu.memory_space<vmem>>, vector<8x256xf32>
      tpu.vector_store %arg6[%c0_203, %c0_204], %394 {strides = array<i32>} : memref<8x256xf32, #tpu.memory_space<vmem>>, vector<8x256xf32>,
    } else {
    }
    %c0 = arith.constant 0 : index
    %c0_1 = arith.constant 0 : index
    %c0_2 = arith.constant 0 : index
    %3 = vector.load %arg4[%c0, %c0_1, %c0_2] : memref<5x8x1xf32, #tpu.memory_space<vmem>>, vector<1x8x1xf32>
    %4 = vector.shape_cast %3 : vector<1x8x1xf32> to vector<8x1xf32>
    %5 = vector.shape_cast %4 : vector<8x1xf32> to vector<8x1xf32>
    %6 = vector.broadcast %5 : vector<8x1xf32> to vector<8x256xf32>
    %c1 = arith.constant 1 : index
    %c0_3 = arith.constant 0 : index
    %c0_4 = arith.constant 0 : index
    %7 = vector.load %arg4[%c1, %c0_3, %c0_4] : memref<5x8x1xf32, #tpu.memory_space<vmem>>, vector<1x8x1xf32>
    %8 = vector.shape_cast %7 : vector<1x8x1xf32> to vector<8x1xf32>
    %9 = vector.shape_cast %8 : vector<8x1xf32> to vector<8x1xf32>
    %10 = vector.broadcast %9 : vector<8x1xf32> to vector<8x256xf32>
    %c2 = arith.constant 2 : index
    %c0_5 = arith.constant 0 : index
    %c0_6 = arith.constant 0 : index
    %11 = vector.load %arg4[%c2, %c0_5, %c0_6] : memref<5x8x1xf32, #tpu.memory_space<vmem>>, vector<1x8x1xf32>
    %12 = vector.shape_cast %11 : vector<1x8x1xf32> to vector<8x1xf32>
    %13 = vector.shape_cast %12 : vector<8x1xf32> to vector<8x1xf32>
    %14 = vector.broadcast %13 : vector<8x1xf32> to vector<8x256xf32>
    %c3 = arith.constant 3 : index
    %c0_7 = arith.constant 0 : index
    %c0_8 = arith.constant 0 : index
    %15 = vector.load %arg4[%c3, %c0_7, %c0_8] : memref<5x8x1xf32, #tpu.memory_space<vmem>>, vector<1x8x1xf32>
    %16 = vector.shape_cast %15 : vector<1x8x1xf32> to vector<8x1xf32>
    %17 = vector.shape_cast %16 : vector<8x1xf32> to vector<8x1xf32>
    %18 = vector.broadcast %17 : vector<8x1xf32> to vector<8x256xf32>
    %c4 = arith.constant 4 : index
    %c0_9 = arith.constant 0 : index
    %c0_10 = arith.constant 0 : index
    %19 = vector.load %arg4[%c4, %c0_9, %c0_10] : memref<5x8x1xf32, #tpu.memory_space<vmem>>, vector<1x8x1xf32>
    %20 = vector.shape_cast %19 : vector<1x8x1xf32> to vector<8x1xf32>
    %21 = vector.shape_cast %20 : vector<8x1xf32> to vector<8x1xf32>
    %22 = vector.broadcast %21 : vector<8x1xf32> to vector<8x256xf32>
    %c0_11 = arith.constant 0 : index
    %c0_12 = arith.constant 0 : index
    %23 = vector.load %arg3[%c0_11, %c0_12] : memref<8x72xbf16, #tpu.memory_space<vmem>>, vector<8x72xbf16>
    %c0_i32_13 = arith.constant 0 : i32
    %c0_14 = arith.constant 0 : index
    %24 = arith.index_cast %c0_i32_13 : i32 to index
    %c0_15 = arith.constant 0 : index
    %c0_16 = arith.constant 0 : index
    %25 = vector.load %arg2[%c0_14, %24, %c0_15, %c0_16] : memref<1x8x72x256xbf16, #tpu.memory_space<vmem>>, vector<1x1x72x256xbf16>
    %26 = vector.shape_cast %25 : vector<1x1x72x256xbf16> to vector<72x256xbf16>
    %cst = arith.constant dense<0.000000e+00> : vector<8x256xf32>
    %27 = tpu.matmul %23, %26, %cst {dimension_numbers = #tpu.dot_dimension_numbers<[1], [0], [0], [1], [0, 0, 1, 1], [], []>} : vector<8x72xbf16>, vector<72x256xbf16>, vector<8x256xf32> -> vector<8x256xf32>
    %28 = arith.addf %27, %22 : vector<8x256xf32>
    %cst_17 = arith.constant 5.000000e-01 : f32
    %29 = vector.broadcast %cst_17 : f32 to vector<8x256xf32>
    %30 = arith.mulf %29, %28 : vector<8x256xf32>
    %31 = math.tanh %30 : vector<8x256xf32>
    %cst_18 = arith.constant 5.000000e-01 : f32
    %32 = vector.broadcast %cst_18 : f32 to vector<8x256xf32>
    %33 = arith.mulf %32, %31 : vector<8x256xf32>
    %cst_19 = arith.constant 5.000000e-01 : f32
    %34 = vector.broadcast %cst_19 : f32 to vector<8x256xf32>
    %35 = arith.addf %33, %34 : vector<8x256xf32>
    %36 = arith.mulf %6, %35 : vector<8x256xf32>
    %37 = arith.addf %10, %36 : vector<8x256xf32>
    %38 = arith.divf %14, %37 : vector<8x256xf32>
    %cst_20 = arith.constant 2.500000e-01 : f32
    %39 = vector.broadcast %cst_20 : f32 to vector<8x256xf32>
    %40 = arith.mulf %39, %38 : vector<8x256xf32>
    %41 = arith.index_cast %c0_i32_13 : i32 to index
    %c0_21 = arith.constant 0 : index
    %c0_22 = arith.constant 0 : index
    %42 = vector.load %arg7[%41, %c0_21, %c0_22] : memref<8x8x256xf32, #tpu.memory_space<vmem>>, vector<1x8x256xf32>
    %43 = vector.shape_cast %42 : vector<1x8x256xf32> to vector<8x256xf32>
    %44 = vector.shape_cast %40 : vector<8x256xf32> to vector<1x8x256xf32>
    tpu.vector_store %arg7[%41, %c0_21, %c0_22], %44 {strides = array<i32>} : memref<8x8x256xf32, #tpu.memory_space<vmem>>, vector<1x8x256xf32>,
    %45 = arith.mulf %28, %18 : vector<8x256xf32>
    %cst_23 = arith.constant 5.000000e-01 : f32
    %46 = vector.broadcast %cst_23 : f32 to vector<8x256xf32>
    %47 = arith.mulf %46, %45 : vector<8x256xf32>
    %48 = arith.addf %40, %47 : vector<8x256xf32>
    %49 = arith.index_cast %c0_i32_13 : i32 to index
    %c0_24 = arith.constant 0 : index
    %c0_25 = arith.constant 0 : index
    %50 = vector.load %arg8[%49, %c0_24, %c0_25] : memref<8x8x256xf32, #tpu.memory_space<vmem>>, vector<1x8x256xf32>
    %51 = vector.shape_cast %50 : vector<1x8x256xf32> to vector<8x256xf32>
    %52 = vector.shape_cast %48 : vector<8x256xf32> to vector<1x8x256xf32>
    tpu.vector_store %arg8[%49, %c0_24, %c0_25], %52 {strides = array<i32>} : memref<8x8x256xf32, #tpu.memory_space<vmem>>, vector<1x8x256xf32>,
    %c1_i32 = arith.constant 1 : i32
    %c0_26 = arith.constant 0 : index
    %53 = arith.index_cast %c1_i32 : i32 to index
    %c0_27 = arith.constant 0 : index
    %c0_28 = arith.constant 0 : index
    %54 = vector.load %arg2[%c0_26, %53, %c0_27, %c0_28] : memref<1x8x72x256xbf16, #tpu.memory_space<vmem>>, vector<1x1x72x256xbf16>
    %55 = vector.shape_cast %54 : vector<1x1x72x256xbf16> to vector<72x256xbf16>
    %cst_29 = arith.constant dense<0.000000e+00> : vector<8x256xf32>
    %56 = tpu.matmul %23, %55, %cst_29 {dimension_numbers = #tpu.dot_dimension_numbers<[1], [0], [0], [1], [0, 0, 1, 1], [], []>} : vector<8x72xbf16>, vector<72x256xbf16>, vector<8x256xf32> -> vector<8x256xf32>
    %57 = arith.addf %56, %22 : vector<8x256xf32>
    %cst_30 = arith.constant 5.000000e-01 : f32
    %58 = vector.broadcast %cst_30 : f32 to vector<8x256xf32>
    %59 = arith.mulf %58, %57 : vector<8x256xf32>
    %60 = math.tanh %59 : vector<8x256xf32>
    %cst_31 = arith.constant 5.000000e-01 : f32
    %61 = vector.broadcast %cst_31 : f32 to vector<8x256xf32>
    %62 = arith.mulf %61, %60 : vector<8x256xf32>
    %cst_32 = arith.constant 5.000000e-01 : f32
    %63 = vector.broadcast %cst_32 : f32 to vector<8x256xf32>
    %64 = arith.addf %62, %63 : vector<8x256xf32>
    %65 = arith.mulf %6, %64 : vector<8x256xf32>
    %66 = arith.addf %10, %65 : vector<8x256xf32>
    %67 = arith.divf %14, %66 : vector<8x256xf32>
    %cst_33 = arith.constant 2.500000e-01 : f32
    %68 = vector.broadcast %cst_33 : f32 to vector<8x256xf32>
    %69 = arith.mulf %68, %67 : vector<8x256xf32>
    %70 = arith.index_cast %c1_i32 : i32 to index
    %c0_34 = arith.constant 0 : index
    %c0_35 = arith.constant 0 : index
    %71 = vector.load %arg7[%70, %c0_34, %c0_35] : memref<8x8x256xf32, #tpu.memory_space<vmem>>, vector<1x8x256xf32>
    %72 = vector.shape_cast %71 : vector<1x8x256xf32> to vector<8x256xf32>
    %73 = vector.shape_cast %69 : vector<8x256xf32> to vector<1x8x256xf32>
    tpu.vector_store %arg7[%70, %c0_34, %c0_35], %73 {strides = array<i32>} : memref<8x8x256xf32, #tpu.memory_space<vmem>>, vector<1x8x256xf32>,
    %74 = arith.mulf %57, %18 : vector<8x256xf32>
    %cst_36 = arith.constant 5.000000e-01 : f32
    %75 = vector.broadcast %cst_36 : f32 to vector<8x256xf32>
    %76 = arith.mulf %75, %74 : vector<8x256xf32>
    %77 = arith.addf %69, %76 : vector<8x256xf32>
    %78 = arith.index_cast %c1_i32 : i32 to index
    %c0_37 = arith.constant 0 : index
    %c0_38 = arith.constant 0 : index
    %79 = vector.load %arg8[%78, %c0_37, %c0_38] : memref<8x8x256xf32, #tpu.memory_space<vmem>>, vector<1x8x256xf32>
    %80 = vector.shape_cast %79 : vector<1x8x256xf32> to vector<8x256xf32>
    %81 = vector.shape_cast %77 : vector<8x256xf32> to vector<1x8x256xf32>
    tpu.vector_store %arg8[%78, %c0_37, %c0_38], %81 {strides = array<i32>} : memref<8x8x256xf32, #tpu.memory_space<vmem>>, vector<1x8x256xf32>,
    %c2_i32 = arith.constant 2 : i32
    %c0_39 = arith.constant 0 : index
    %82 = arith.index_cast %c2_i32 : i32 to index
    %c0_40 = arith.constant 0 : index
    %c0_41 = arith.constant 0 : index
    %83 = vector.load %arg2[%c0_39, %82, %c0_40, %c0_41] : memref<1x8x72x256xbf16, #tpu.memory_space<vmem>>, vector<1x1x72x256xbf16>
    %84 = vector.shape_cast %83 : vector<1x1x72x256xbf16> to vector<72x256xbf16>
    %cst_42 = arith.constant dense<0.000000e+00> : vector<8x256xf32>
    %85 = tpu.matmul %23, %84, %cst_42 {dimension_numbers = #tpu.dot_dimension_numbers<[1], [0], [0], [1], [0, 0, 1, 1], [], []>} : vector<8x72xbf16>, vector<72x256xbf16>, vector<8x256xf32> -> vector<8x256xf32>
    %86 = arith.addf %85, %22 : vector<8x256xf32>
    %cst_43 = arith.constant 5.000000e-01 : f32
    %87 = vector.broadcast %cst_43 : f32 to vector<8x256xf32>
    %88 = arith.mulf %87, %86 : vector<8x256xf32>
    %89 = math.tanh %88 : vector<8x256xf32>
    %cst_44 = arith.constant 5.000000e-01 : f32
    %90 = vector.broadcast %cst_44 : f32 to vector<8x256xf32>
    %91 = arith.mulf %90, %89 : vector<8x256xf32>
    %cst_45 = arith.constant 5.000000e-01 : f32
    %92 = vector.broadcast %cst_45 : f32 to vector<8x256xf32>
    %93 = arith.addf %91, %92 : vector<8x256xf32>
    %94 = arith.mulf %6, %93 : vector<8x256xf32>
    %95 = arith.addf %10, %94 : vector<8x256xf32>
    %96 = arith.divf %14, %95 : vector<8x256xf32>
    %cst_46 = arith.constant 2.500000e-01 : f32
    %97 = vector.broadcast %cst_46 : f32 to vector<8x256xf32>
    %98 = arith.mulf %97, %96 : vector<8x256xf32>
    %99 = arith.index_cast %c2_i32 : i32 to index
    %c0_47 = arith.constant 0 : index
    %c0_48 = arith.constant 0 : index
    %100 = vector.load %arg7[%99, %c0_47, %c0_48] : memref<8x8x256xf32, #tpu.memory_space<vmem>>, vector<1x8x256xf32>
    %101 = vector.shape_cast %100 : vector<1x8x256xf32> to vector<8x256xf32>
    %102 = vector.shape_cast %98 : vector<8x256xf32> to vector<1x8x256xf32>
    tpu.vector_store %arg7[%99, %c0_47, %c0_48], %102 {strides = array<i32>} : memref<8x8x256xf32, #tpu.memory_space<vmem>>, vector<1x8x256xf32>,
    %103 = arith.mulf %86, %18 : vector<8x256xf32>
    %cst_49 = arith.constant 5.000000e-01 : f32
    %104 = vector.broadcast %cst_49 : f32 to vector<8x256xf32>
    %105 = arith.mulf %104, %103 : vector<8x256xf32>
    %106 = arith.addf %98, %105 : vector<8x256xf32>
    %107 = arith.index_cast %c2_i32 : i32 to index
    %c0_50 = arith.constant 0 : index
    %c0_51 = arith.constant 0 : index
    %108 = vector.load %arg8[%107, %c0_50, %c0_51] : memref<8x8x256xf32, #tpu.memory_space<vmem>>, vector<1x8x256xf32>
    %109 = vector.shape_cast %108 : vector<1x8x256xf32> to vector<8x256xf32>
    %110 = vector.shape_cast %106 : vector<8x256xf32> to vector<1x8x256xf32>
    tpu.vector_store %arg8[%107, %c0_50, %c0_51], %110 {strides = array<i32>} : memref<8x8x256xf32, #tpu.memory_space<vmem>>, vector<1x8x256xf32>,
    %c3_i32 = arith.constant 3 : i32
    %c0_52 = arith.constant 0 : index
    %111 = arith.index_cast %c3_i32 : i32 to index
    %c0_53 = arith.constant 0 : index
    %c0_54 = arith.constant 0 : index
    %112 = vector.load %arg2[%c0_52, %111, %c0_53, %c0_54] : memref<1x8x72x256xbf16, #tpu.memory_space<vmem>>, vector<1x1x72x256xbf16>
    %113 = vector.shape_cast %112 : vector<1x1x72x256xbf16> to vector<72x256xbf16>
    %cst_55 = arith.constant dense<0.000000e+00> : vector<8x256xf32>
    %114 = tpu.matmul %23, %113, %cst_55 {dimension_numbers = #tpu.dot_dimension_numbers<[1], [0], [0], [1], [0, 0, 1, 1], [], []>} : vector<8x72xbf16>, vector<72x256xbf16>, vector<8x256xf32> -> vector<8x256xf32>
    %115 = arith.addf %114, %22 : vector<8x256xf32>
    %cst_56 = arith.constant 5.000000e-01 : f32
    %116 = vector.broadcast %cst_56 : f32 to vector<8x256xf32>
    %117 = arith.mulf %116, %115 : vector<8x256xf32>
    %118 = math.tanh %117 : vector<8x256xf32>
    %cst_57 = arith.constant 5.000000e-01 : f32
    %119 = vector.broadcast %cst_57 : f32 to vector<8x256xf32>
    %120 = arith.mulf %119, %118 : vector<8x256xf32>
    %cst_58 = arith.constant 5.000000e-01 : f32
    %121 = vector.broadcast %cst_58 : f32 to vector<8x256xf32>
    %122 = arith.addf %120, %121 : vector<8x256xf32>
    %123 = arith.mulf %6, %122 : vector<8x256xf32>
    %124 = arith.addf %10, %123 : vector<8x256xf32>
    %125 = arith.divf %14, %124 : vector<8x256xf32>
    %cst_59 = arith.constant 2.500000e-01 : f32
    %126 = vector.broadcast %cst_59 : f32 to vector<8x256xf32>
    %127 = arith.mulf %126, %125 : vector<8x256xf32>
    %128 = arith.index_cast %c3_i32 : i32 to index
    %c0_60 = arith.constant 0 : index
    %c0_61 = arith.constant 0 : index
    %129 = vector.load %arg7[%128, %c0_60, %c0_61] : memref<8x8x256xf32, #tpu.memory_space<vmem>>, vector<1x8x256xf32>
    %130 = vector.shape_cast %129 : vector<1x8x256xf32> to vector<8x256xf32>
    %131 = vector.shape_cast %127 : vector<8x256xf32> to vector<1x8x256xf32>
    tpu.vector_store %arg7[%128, %c0_60, %c0_61], %131 {strides = array<i32>} : memref<8x8x256xf32, #tpu.memory_space<vmem>>, vector<1x8x256xf32>,
    %132 = arith.mulf %115, %18 : vector<8x256xf32>
    %cst_62 = arith.constant 5.000000e-01 : f32
    %133 = vector.broadcast %cst_62 : f32 to vector<8x256xf32>
    %134 = arith.mulf %133, %132 : vector<8x256xf32>
    %135 = arith.addf %127, %134 : vector<8x256xf32>
    %136 = arith.index_cast %c3_i32 : i32 to index
    %c0_63 = arith.constant 0 : index
    %c0_64 = arith.constant 0 : index
    %137 = vector.load %arg8[%136, %c0_63, %c0_64] : memref<8x8x256xf32, #tpu.memory_space<vmem>>, vector<1x8x256xf32>
    %138 = vector.shape_cast %137 : vector<1x8x256xf32> to vector<8x256xf32>
    %139 = vector.shape_cast %135 : vector<8x256xf32> to vector<1x8x256xf32>
    tpu.vector_store %arg8[%136, %c0_63, %c0_64], %139 {strides = array<i32>} : memref<8x8x256xf32, #tpu.memory_space<vmem>>, vector<1x8x256xf32>,
    %c4_i32 = arith.constant 4 : i32
    %c0_65 = arith.constant 0 : index
    %140 = arith.index_cast %c4_i32 : i32 to index
    %c0_66 = arith.constant 0 : index
    %c0_67 = arith.constant 0 : index
    %141 = vector.load %arg2[%c0_65, %140, %c0_66, %c0_67] : memref<1x8x72x256xbf16, #tpu.memory_space<vmem>>, vector<1x1x72x256xbf16>
    %142 = vector.shape_cast %141 : vector<1x1x72x256xbf16> to vector<72x256xbf16>
    %cst_68 = arith.constant dense<0.000000e+00> : vector<8x256xf32>
    %143 = tpu.matmul %23, %142, %cst_68 {dimension_numbers = #tpu.dot_dimension_numbers<[1], [0], [0], [1], [0, 0, 1, 1], [], []>} : vector<8x72xbf16>, vector<72x256xbf16>, vector<8x256xf32> -> vector<8x256xf32>
    %144 = arith.addf %143, %22 : vector<8x256xf32>
    %cst_69 = arith.constant 5.000000e-01 : f32
    %145 = vector.broadcast %cst_69 : f32 to vector<8x256xf32>
    %146 = arith.mulf %145, %144 : vector<8x256xf32>
    %147 = math.tanh %146 : vector<8x256xf32>
    %cst_70 = arith.constant 5.000000e-01 : f32
    %148 = vector.broadcast %cst_70 : f32 to vector<8x256xf32>
    %149 = arith.mulf %148, %147 : vector<8x256xf32>
    %cst_71 = arith.constant 5.000000e-01 : f32
    %150 = vector.broadcast %cst_71 : f32 to vector<8x256xf32>
    %151 = arith.addf %149, %150 : vector<8x256xf32>
    %152 = arith.mulf %6, %151 : vector<8x256xf32>
    %153 = arith.addf %10, %152 : vector<8x256xf32>
    %154 = arith.divf %14, %153 : vector<8x256xf32>
    %cst_72 = arith.constant 2.500000e-01 : f32
    %155 = vector.broadcast %cst_72 : f32 to vector<8x256xf32>
    %156 = arith.mulf %155, %154 : vector<8x256xf32>
    %157 = arith.index_cast %c4_i32 : i32 to index
    %c0_73 = arith.constant 0 : index
    %c0_74 = arith.constant 0 : index
    %158 = vector.load %arg7[%157, %c0_73, %c0_74] : memref<8x8x256xf32, #tpu.memory_space<vmem>>, vector<1x8x256xf32>
    %159 = vector.shape_cast %158 : vector<1x8x256xf32> to vector<8x256xf32>
    %160 = vector.shape_cast %156 : vector<8x256xf32> to vector<1x8x256xf32>
    tpu.vector_store %arg7[%157, %c0_73, %c0_74], %160 {strides = array<i32>} : memref<8x8x256xf32, #tpu.memory_space<vmem>>, vector<1x8x256xf32>,
    %161 = arith.mulf %144, %18 : vector<8x256xf32>
    %cst_75 = arith.constant 5.000000e-01 : f32
    %162 = vector.broadcast %cst_75 : f32 to vector<8x256xf32>
    %163 = arith.mulf %162, %161 : vector<8x256xf32>
    %164 = arith.addf %156, %163 : vector<8x256xf32>
    %165 = arith.index_cast %c4_i32 : i32 to index
    %c0_76 = arith.constant 0 : index
    %c0_77 = arith.constant 0 : index
    %166 = vector.load %arg8[%165, %c0_76, %c0_77] : memref<8x8x256xf32, #tpu.memory_space<vmem>>, vector<1x8x256xf32>
    %167 = vector.shape_cast %166 : vector<1x8x256xf32> to vector<8x256xf32>
    %168 = vector.shape_cast %164 : vector<8x256xf32> to vector<1x8x256xf32>
    tpu.vector_store %arg8[%165, %c0_76, %c0_77], %168 {strides = array<i32>} : memref<8x8x256xf32, #tpu.memory_space<vmem>>, vector<1x8x256xf32>,
    %c5_i32 = arith.constant 5 : i32
    %c0_78 = arith.constant 0 : index
    %169 = arith.index_cast %c5_i32 : i32 to index
    %c0_79 = arith.constant 0 : index
    %c0_80 = arith.constant 0 : index
    %170 = vector.load %arg2[%c0_78, %169, %c0_79, %c0_80] : memref<1x8x72x256xbf16, #tpu.memory_space<vmem>>, vector<1x1x72x256xbf16>
    %171 = vector.shape_cast %170 : vector<1x1x72x256xbf16> to vector<72x256xbf16>
    %cst_81 = arith.constant dense<0.000000e+00> : vector<8x256xf32>
    %172 = tpu.matmul %23, %171, %cst_81 {dimension_numbers = #tpu.dot_dimension_numbers<[1], [0], [0], [1], [0, 0, 1, 1], [], []>} : vector<8x72xbf16>, vector<72x256xbf16>, vector<8x256xf32> -> vector<8x256xf32>
    %173 = arith.addf %172, %22 : vector<8x256xf32>
    %cst_82 = arith.constant 5.000000e-01 : f32
    %174 = vector.broadcast %cst_82 : f32 to vector<8x256xf32>
    %175 = arith.mulf %174, %173 : vector<8x256xf32>
    %176 = math.tanh %175 : vector<8x256xf32>
    %cst_83 = arith.constant 5.000000e-01 : f32
    %177 = vector.broadcast %cst_83 : f32 to vector<8x256xf32>
    %178 = arith.mulf %177, %176 : vector<8x256xf32>
    %cst_84 = arith.constant 5.000000e-01 : f32
    %179 = vector.broadcast %cst_84 : f32 to vector<8x256xf32>
    %180 = arith.addf %178, %179 : vector<8x256xf32>
    %181 = arith.mulf %6, %180 : vector<8x256xf32>
    %182 = arith.addf %10, %181 : vector<8x256xf32>
    %183 = arith.divf %14, %182 : vector<8x256xf32>
    %cst_85 = arith.constant 2.500000e-01 : f32
    %184 = vector.broadcast %cst_85 : f32 to vector<8x256xf32>
    %185 = arith.mulf %184, %183 : vector<8x256xf32>
    %186 = arith.index_cast %c5_i32 : i32 to index
    %c0_86 = arith.constant 0 : index
    %c0_87 = arith.constant 0 : index
    %187 = vector.load %arg7[%186, %c0_86, %c0_87] : memref<8x8x256xf32, #tpu.memory_space<vmem>>, vector<1x8x256xf32>
    %188 = vector.shape_cast %187 : vector<1x8x256xf32> to vector<8x256xf32>
    %189 = vector.shape_cast %185 : vector<8x256xf32> to vector<1x8x256xf32>
    tpu.vector_store %arg7[%186, %c0_86, %c0_87], %189 {strides = array<i32>} : memref<8x8x256xf32, #tpu.memory_space<vmem>>, vector<1x8x256xf32>,
    %190 = arith.mulf %173, %18 : vector<8x256xf32>
    %cst_88 = arith.constant 5.000000e-01 : f32
    %191 = vector.broadcast %cst_88 : f32 to vector<8x256xf32>
    %192 = arith.mulf %191, %190 : vector<8x256xf32>
    %193 = arith.addf %185, %192 : vector<8x256xf32>
    %194 = arith.index_cast %c5_i32 : i32 to index
    %c0_89 = arith.constant 0 : index
    %c0_90 = arith.constant 0 : index
    %195 = vector.load %arg8[%194, %c0_89, %c0_90] : memref<8x8x256xf32, #tpu.memory_space<vmem>>, vector<1x8x256xf32>
    %196 = vector.shape_cast %195 : vector<1x8x256xf32> to vector<8x256xf32>
    %197 = vector.shape_cast %193 : vector<8x256xf32> to vector<1x8x256xf32>
    tpu.vector_store %arg8[%194, %c0_89, %c0_90], %197 {strides = array<i32>} : memref<8x8x256xf32, #tpu.memory_space<vmem>>, vector<1x8x256xf32>,
    %c6_i32 = arith.constant 6 : i32
    %c0_91 = arith.constant 0 : index
    %198 = arith.index_cast %c6_i32 : i32 to index
    %c0_92 = arith.constant 0 : index
    %c0_93 = arith.constant 0 : index
    %199 = vector.load %arg2[%c0_91, %198, %c0_92, %c0_93] : memref<1x8x72x256xbf16, #tpu.memory_space<vmem>>, vector<1x1x72x256xbf16>
    %200 = vector.shape_cast %199 : vector<1x1x72x256xbf16> to vector<72x256xbf16>
    %cst_94 = arith.constant dense<0.000000e+00> : vector<8x256xf32>
    %201 = tpu.matmul %23, %200, %cst_94 {dimension_numbers = #tpu.dot_dimension_numbers<[1], [0], [0], [1], [0, 0, 1, 1], [], []>} : vector<8x72xbf16>, vector<72x256xbf16>, vector<8x256xf32> -> vector<8x256xf32>
    %202 = arith.addf %201, %22 : vector<8x256xf32>
    %cst_95 = arith.constant 5.000000e-01 : f32
    %203 = vector.broadcast %cst_95 : f32 to vector<8x256xf32>
    %204 = arith.mulf %203, %202 : vector<8x256xf32>
    %205 = math.tanh %204 : vector<8x256xf32>
    %cst_96 = arith.constant 5.000000e-01 : f32
    %206 = vector.broadcast %cst_96 : f32 to vector<8x256xf32>
    %207 = arith.mulf %206, %205 : vector<8x256xf32>
    %cst_97 = arith.constant 5.000000e-01 : f32
    %208 = vector.broadcast %cst_97 : f32 to vector<8x256xf32>
    %209 = arith.addf %207, %208 : vector<8x256xf32>
    %210 = arith.mulf %6, %209 : vector<8x256xf32>
    %211 = arith.addf %10, %210 : vector<8x256xf32>
    %212 = arith.divf %14, %211 : vector<8x256xf32>
    %cst_98 = arith.constant 2.500000e-01 : f32
    %213 = vector.broadcast %cst_98 : f32 to vector<8x256xf32>
    %214 = arith.mulf %213, %212 : vector<8x256xf32>
    %215 = arith.index_cast %c6_i32 : i32 to index
    %c0_99 = arith.constant 0 : index
    %c0_100 = arith.constant 0 : index
    %216 = vector.load %arg7[%215, %c0_99, %c0_100] : memref<8x8x256xf32, #tpu.memory_space<vmem>>, vector<1x8x256xf32>
    %217 = vector.shape_cast %216 : vector<1x8x256xf32> to vector<8x256xf32>
    %218 = vector.shape_cast %214 : vector<8x256xf32> to vector<1x8x256xf32>
    tpu.vector_store %arg7[%215, %c0_99, %c0_100], %218 {strides = array<i32>} : memref<8x8x256xf32, #tpu.memory_space<vmem>>, vector<1x8x256xf32>,
    %219 = arith.mulf %202, %18 : vector<8x256xf32>
    %cst_101 = arith.constant 5.000000e-01 : f32
    %220 = vector.broadcast %cst_101 : f32 to vector<8x256xf32>
    %221 = arith.mulf %220, %219 : vector<8x256xf32>
    %222 = arith.addf %214, %221 : vector<8x256xf32>
    %223 = arith.index_cast %c6_i32 : i32 to index
    %c0_102 = arith.constant 0 : index
    %c0_103 = arith.constant 0 : index
    %224 = vector.load %arg8[%223, %c0_102, %c0_103] : memref<8x8x256xf32, #tpu.memory_space<vmem>>, vector<1x8x256xf32>
    %225 = vector.shape_cast %224 : vector<1x8x256xf32> to vector<8x256xf32>
    %226 = vector.shape_cast %222 : vector<8x256xf32> to vector<1x8x256xf32>
    tpu.vector_store %arg8[%223, %c0_102, %c0_103], %226 {strides = array<i32>} : memref<8x8x256xf32, #tpu.memory_space<vmem>>, vector<1x8x256xf32>,
    %c7_i32 = arith.constant 7 : i32
    %c0_104 = arith.constant 0 : index
    %227 = arith.index_cast %c7_i32 : i32 to index
    %c0_105 = arith.constant 0 : index
    %c0_106 = arith.constant 0 : index
    %228 = vector.load %arg2[%c0_104, %227, %c0_105, %c0_106] : memref<1x8x72x256xbf16, #tpu.memory_space<vmem>>, vector<1x1x72x256xbf16>
    %229 = vector.shape_cast %228 : vector<1x1x72x256xbf16> to vector<72x256xbf16>
    %cst_107 = arith.constant dense<0.000000e+00> : vector<8x256xf32>
    %230 = tpu.matmul %23, %229, %cst_107 {dimension_numbers = #tpu.dot_dimension_numbers<[1], [0], [0], [1], [0, 0, 1, 1], [], []>} : vector<8x72xbf16>, vector<72x256xbf16>, vector<8x256xf32> -> vector<8x256xf32>
    %231 = arith.addf %230, %22 : vector<8x256xf32>
    %cst_108 = arith.constant 5.000000e-01 : f32
    %232 = vector.broadcast %cst_108 : f32 to vector<8x256xf32>
    %233 = arith.mulf %232, %231 : vector<8x256xf32>
    %234 = math.tanh %233 : vector<8x256xf32>
    %cst_109 = arith.constant 5.000000e-01 : f32
    %235 = vector.broadcast %cst_109 : f32 to vector<8x256xf32>
    %236 = arith.mulf %235, %234 : vector<8x256xf32>
    %cst_110 = arith.constant 5.000000e-01 : f32
    %237 = vector.broadcast %cst_110 : f32 to vector<8x256xf32>
    %238 = arith.addf %236, %237 : vector<8x256xf32>
    %239 = arith.mulf %6, %238 : vector<8x256xf32>
    %240 = arith.addf %10, %239 : vector<8x256xf32>
    %241 = arith.divf %14, %240 : vector<8x256xf32>
    %cst_111 = arith.constant 2.500000e-01 : f32
    %242 = vector.broadcast %cst_111 : f32 to vector<8x256xf32>
    %243 = arith.mulf %242, %241 : vector<8x256xf32>
    %244 = arith.index_cast %c7_i32 : i32 to index
    %c0_112 = arith.constant 0 : index
    %c0_113 = arith.constant 0 : index
    %245 = vector.load %arg7[%244, %c0_112, %c0_113] : memref<8x8x256xf32, #tpu.memory_space<vmem>>, vector<1x8x256xf32>
    %246 = vector.shape_cast %245 : vector<1x8x256xf32> to vector<8x256xf32>
    %247 = vector.shape_cast %243 : vector<8x256xf32> to vector<1x8x256xf32>
    tpu.vector_store %arg7[%244, %c0_112, %c0_113], %247 {strides = array<i32>} : memref<8x8x256xf32, #tpu.memory_space<vmem>>, vector<1x8x256xf32>,
    %248 = arith.mulf %231, %18 : vector<8x256xf32>
    %cst_114 = arith.constant 5.000000e-01 : f32
    %249 = vector.broadcast %cst_114 : f32 to vector<8x256xf32>
    %250 = arith.mulf %249, %248 : vector<8x256xf32>
    %251 = arith.addf %243, %250 : vector<8x256xf32>
    %252 = arith.index_cast %c7_i32 : i32 to index
    %c0_115 = arith.constant 0 : index
    %c0_116 = arith.constant 0 : index
    %253 = vector.load %arg8[%252, %c0_115, %c0_116] : memref<8x8x256xf32, #tpu.memory_space<vmem>>, vector<1x8x256xf32>
    %254 = vector.shape_cast %253 : vector<1x8x256xf32> to vector<8x256xf32>
    %255 = vector.shape_cast %251 : vector<8x256xf32> to vector<1x8x256xf32>
    tpu.vector_store %arg8[%252, %c0_115, %c0_116], %255 {strides = array<i32>} : memref<8x8x256xf32, #tpu.memory_space<vmem>>, vector<1x8x256xf32>,
    %c8_i32 = arith.constant 8 : i32
    %c0_117 = arith.constant 0 : index
    %c0_118 = arith.constant 0 : index
    %256 = vector.load %arg6[%c0_117, %c0_118] : memref<8x256xf32, #tpu.memory_space<vmem>>, vector<8x256xf32>
    %c0_i32_119 = arith.constant 0 : i32
    %257 = arith.index_cast %c0_i32_119 : i32 to index
    %c0_120 = arith.constant 0 : index
    %c0_121 = arith.constant 0 : index
    %258 = vector.load %arg7[%257, %c0_120, %c0_121] : memref<8x8x256xf32, #tpu.memory_space<vmem>>, vector<1x8x256xf32>
    %259 = vector.shape_cast %258 : vector<1x8x256xf32> to vector<8x256xf32>
    %260 = arith.mulf %259, %256 : vector<8x256xf32>
    %261 = arith.index_cast %c0_i32_119 : i32 to index
    %c0_122 = arith.constant 0 : index
    %c0_123 = arith.constant 0 : index
    %262 = vector.load %arg8[%261, %c0_122, %c0_123] : memref<8x8x256xf32, #tpu.memory_space<vmem>>, vector<1x8x256xf32>
    %263 = vector.shape_cast %262 : vector<1x8x256xf32> to vector<8x256xf32>
    %264 = arith.addf %260, %263 : vector<8x256xf32>
    %265 = math.tanh %264 : vector<8x256xf32>
    %cst_124 = arith.constant 5.000000e-01 : f32
    %266 = vector.broadcast %cst_124 : f32 to vector<8x256xf32>
    %267 = arith.mulf %266, %265 : vector<8x256xf32>
    %cst_125 = arith.constant 5.000000e-01 : f32
    %268 = vector.broadcast %cst_125 : f32 to vector<8x256xf32>
    %269 = arith.addf %267, %268 : vector<8x256xf32>
    %c0_126 = arith.constant 0 : index
    %270 = arith.index_cast %c0_i32_119 : i32 to index
    %c0_127 = arith.constant 0 : index
    %c0_128 = arith.constant 0 : index
    %271 = vector.load %arg5[%c0_126, %270, %c0_127, %c0_128] : memref<1x8x8x256xf32, #tpu.memory_space<vmem>>, vector<1x1x8x256xf32>
    %272 = vector.shape_cast %271 : vector<1x1x8x256xf32> to vector<8x256xf32>
    %273 = vector.shape_cast %269 : vector<8x256xf32> to vector<1x1x8x256xf32>
    tpu.vector_store %arg5[%c0_126, %270, %c0_127, %c0_128], %273 {strides = array<i32>} : memref<1x8x8x256xf32, #tpu.memory_space<vmem>>, vector<1x1x8x256xf32>,
    %c1_i32_129 = arith.constant 1 : i32
    %274 = arith.index_cast %c1_i32_129 : i32 to index
    %c0_130 = arith.constant 0 : index
    %c0_131 = arith.constant 0 : index
    %275 = vector.load %arg7[%274, %c0_130, %c0_131] : memref<8x8x256xf32, #tpu.memory_space<vmem>>, vector<1x8x256xf32>
    %276 = vector.shape_cast %275 : vector<1x8x256xf32> to vector<8x256xf32>
    %277 = arith.mulf %276, %265 : vector<8x256xf32>
    %278 = arith.index_cast %c1_i32_129 : i32 to index
    %c0_132 = arith.constant 0 : index
    %c0_133 = arith.constant 0 : index
    %279 = vector.load %arg8[%278, %c0_132, %c0_133] : memref<8x8x256xf32, #tpu.memory_space<vmem>>, vector<1x8x256xf32>
    %280 = vector.shape_cast %279 : vector<1x8x256xf32> to vector<8x256xf32>
    %281 = arith.addf %277, %280 : vector<8x256xf32>
    %282 = math.tanh %281 : vector<8x256xf32>
    %cst_134 = arith.constant 5.000000e-01 : f32
    %283 = vector.broadcast %cst_134 : f32 to vector<8x256xf32>
    %284 = arith.mulf %283, %282 : vector<8x256xf32>
    %cst_135 = arith.constant 5.000000e-01 : f32
    %285 = vector.broadcast %cst_135 : f32 to vector<8x256xf32>
    %286 = arith.addf %284, %285 : vector<8x256xf32>
    %c0_136 = arith.constant 0 : index
    %287 = arith.index_cast %c1_i32_129 : i32 to index
    %c0_137 = arith.constant 0 : index
    %c0_138 = arith.constant 0 : index
    %288 = vector.load %arg5[%c0_136, %287, %c0_137, %c0_138] : memref<1x8x8x256xf32, #tpu.memory_space<vmem>>, vector<1x1x8x256xf32>
    %289 = vector.shape_cast %288 : vector<1x1x8x256xf32> to vector<8x256xf32>
    %290 = vector.shape_cast %286 : vector<8x256xf32> to vector<1x1x8x256xf32>
    tpu.vector_store %arg5[%c0_136, %287, %c0_137, %c0_138], %290 {strides = array<i32>} : memref<1x8x8x256xf32, #tpu.memory_space<vmem>>, vector<1x1x8x256xf32>,
    %c2_i32_139 = arith.constant 2 : i32
    %291 = arith.index_cast %c2_i32_139 : i32 to index
    %c0_140 = arith.constant 0 : index
    %c0_141 = arith.constant 0 : index
    %292 = vector.load %arg7[%291, %c0_140, %c0_141] : memref<8x8x256xf32, #tpu.memory_space<vmem>>, vector<1x8x256xf32>
    %293 = vector.shape_cast %292 : vector<1x8x256xf32> to vector<8x256xf32>
    %294 = arith.mulf %293, %282 : vector<8x256xf32>
    %295 = arith.index_cast %c2_i32_139 : i32 to index
    %c0_142 = arith.constant 0 : index
    %c0_143 = arith.constant 0 : index
    %296 = vector.load %arg8[%295, %c0_142, %c0_143] : memref<8x8x256xf32, #tpu.memory_space<vmem>>, vector<1x8x256xf32>
    %297 = vector.shape_cast %296 : vector<1x8x256xf32> to vector<8x256xf32>
    %298 = arith.addf %294, %297 : vector<8x256xf32>
    %299 = math.tanh %298 : vector<8x256xf32>
    %cst_144 = arith.constant 5.000000e-01 : f32
    %300 = vector.broadcast %cst_144 : f32 to vector<8x256xf32>
    %301 = arith.mulf %300, %299 : vector<8x256xf32>
    %cst_145 = arith.constant 5.000000e-01 : f32
    %302 = vector.broadcast %cst_145 : f32 to vector<8x256xf32>
    %303 = arith.addf %301, %302 : vector<8x256xf32>
    %c0_146 = arith.constant 0 : index
    %304 = arith.index_cast %c2_i32_139 : i32 to index
    %c0_147 = arith.constant 0 : index
    %c0_148 = arith.constant 0 : index
    %305 = vector.load %arg5[%c0_146, %304, %c0_147, %c0_148] : memref<1x8x8x256xf32, #tpu.memory_space<vmem>>, vector<1x1x8x256xf32>
    %306 = vector.shape_cast %305 : vector<1x1x8x256xf32> to vector<8x256xf32>
    %307 = vector.shape_cast %303 : vector<8x256xf32> to vector<1x1x8x256xf32>
    tpu.vector_store %arg5[%c0_146, %304, %c0_147, %c0_148], %307 {strides = array<i32>} : memref<1x8x8x256xf32, #tpu.memory_space<vmem>>, vector<1x1x8x256xf32>,
    %c3_i32_149 = arith.constant 3 : i32
    %308 = arith.index_cast %c3_i32_149 : i32 to index
    %c0_150 = arith.constant 0 : index
    %c0_151 = arith.constant 0 : index
    %309 = vector.load %arg7[%308, %c0_150, %c0_151] : memref<8x8x256xf32, #tpu.memory_space<vmem>>, vector<1x8x256xf32>
    %310 = vector.shape_cast %309 : vector<1x8x256xf32> to vector<8x256xf32>
    %311 = arith.mulf %310, %299 : vector<8x256xf32>
    %312 = arith.index_cast %c3_i32_149 : i32 to index
    %c0_152 = arith.constant 0 : index
    %c0_153 = arith.constant 0 : index
    %313 = vector.load %arg8[%312, %c0_152, %c0_153] : memref<8x8x256xf32, #tpu.memory_space<vmem>>, vector<1x8x256xf32>
    %314 = vector.shape_cast %313 : vector<1x8x256xf32> to vector<8x256xf32>
    %315 = arith.addf %311, %314 : vector<8x256xf32>
    %316 = math.tanh %315 : vector<8x256xf32>
    %cst_154 = arith.constant 5.000000e-01 : f32
    %317 = vector.broadcast %cst_154 : f32 to vector<8x256xf32>
    %318 = arith.mulf %317, %316 : vector<8x256xf32>
    %cst_155 = arith.constant 5.000000e-01 : f32
    %319 = vector.broadcast %cst_155 : f32 to vector<8x256xf32>
    %320 = arith.addf %318, %319 : vector<8x256xf32>
    %c0_156 = arith.constant 0 : index
    %321 = arith.index_cast %c3_i32_149 : i32 to index
    %c0_157 = arith.constant 0 : index
    %c0_158 = arith.constant 0 : index
    %322 = vector.load %arg5[%c0_156, %321, %c0_157, %c0_158] : memref<1x8x8x256xf32, #tpu.memory_space<vmem>>, vector<1x1x8x256xf32>
    %323 = vector.shape_cast %322 : vector<1x1x8x256xf32> to vector<8x256xf32>
    %324 = vector.shape_cast %320 : vector<8x256xf32> to vector<1x1x8x256xf32>
    tpu.vector_store %arg5[%c0_156, %321, %c0_157, %c0_158], %324 {strides = array<i32>} : memref<1x8x8x256xf32, #tpu.memory_space<vmem>>, vector<1x1x8x256xf32>,
    %c4_i32_159 = arith.constant 4 : i32
    %325 = arith.index_cast %c4_i32_159 : i32 to index
    %c0_160 = arith.constant 0 : index
    %c0_161 = arith.constant 0 : index
    %326 = vector.load %arg7[%325, %c0_160, %c0_161] : memref<8x8x256xf32, #tpu.memory_space<vmem>>, vector<1x8x256xf32>
    %327 = vector.shape_cast %326 : vector<1x8x256xf32> to vector<8x256xf32>
    %328 = arith.mulf %327, %316 : vector<8x256xf32>
    %329 = arith.index_cast %c4_i32_159 : i32 to index
    %c0_162 = arith.constant 0 : index
    %c0_163 = arith.constant 0 : index
    %330 = vector.load %arg8[%329, %c0_162, %c0_163] : memref<8x8x256xf32, #tpu.memory_space<vmem>>, vector<1x8x256xf32>
    %331 = vector.shape_cast %330 : vector<1x8x256xf32> to vector<8x256xf32>
    %332 = arith.addf %328, %331 : vector<8x256xf32>
    %333 = math.tanh %332 : vector<8x256xf32>
    %cst_164 = arith.constant 5.000000e-01 : f32
    %334 = vector.broadcast %cst_164 : f32 to vector<8x256xf32>
    %335 = arith.mulf %334, %333 : vector<8x256xf32>
    %cst_165 = arith.constant 5.000000e-01 : f32
    %336 = vector.broadcast %cst_165 : f32 to vector<8x256xf32>
    %337 = arith.addf %335, %336 : vector<8x256xf32>
    %c0_166 = arith.constant 0 : index
    %338 = arith.index_cast %c4_i32_159 : i32 to index
    %c0_167 = arith.constant 0 : index
    %c0_168 = arith.constant 0 : index
    %339 = vector.load %arg5[%c0_166, %338, %c0_167, %c0_168] : memref<1x8x8x256xf32, #tpu.memory_space<vmem>>, vector<1x1x8x256xf32>
    %340 = vector.shape_cast %339 : vector<1x1x8x256xf32> to vector<8x256xf32>
    %341 = vector.shape_cast %337 : vector<8x256xf32> to vector<1x1x8x256xf32>
    tpu.vector_store %arg5[%c0_166, %338, %c0_167, %c0_168], %341 {strides = array<i32>} : memref<1x8x8x256xf32, #tpu.memory_space<vmem>>, vector<1x1x8x256xf32>,
    %c5_i32_169 = arith.constant 5 : i32
    %342 = arith.index_cast %c5_i32_169 : i32 to index
    %c0_170 = arith.constant 0 : index
    %c0_171 = arith.constant 0 : index
    %343 = vector.load %arg7[%342, %c0_170, %c0_171] : memref<8x8x256xf32, #tpu.memory_space<vmem>>, vector<1x8x256xf32>
    %344 = vector.shape_cast %343 : vector<1x8x256xf32> to vector<8x256xf32>
    %345 = arith.mulf %344, %333 : vector<8x256xf32>
    %346 = arith.index_cast %c5_i32_169 : i32 to index
    %c0_172 = arith.constant 0 : index
    %c0_173 = arith.constant 0 : index
    %347 = vector.load %arg8[%346, %c0_172, %c0_173] : memref<8x8x256xf32, #tpu.memory_space<vmem>>, vector<1x8x256xf32>
    %348 = vector.shape_cast %347 : vector<1x8x256xf32> to vector<8x256xf32>
    %349 = arith.addf %345, %348 : vector<8x256xf32>
    %350 = math.tanh %349 : vector<8x256xf32>
    %cst_174 = arith.constant 5.000000e-01 : f32
    %351 = vector.broadcast %cst_174 : f32 to vector<8x256xf32>
    %352 = arith.mulf %351, %350 : vector<8x256xf32>
    %cst_175 = arith.constant 5.000000e-01 : f32
    %353 = vector.broadcast %cst_175 : f32 to vector<8x256xf32>
    %354 = arith.addf %352, %353 : vector<8x256xf32>
    %c0_176 = arith.constant 0 : index
    %355 = arith.index_cast %c5_i32_169 : i32 to index
    %c0_177 = arith.constant 0 : index
    %c0_178 = arith.constant 0 : index
    %356 = vector.load %arg5[%c0_176, %355, %c0_177, %c0_178] : memref<1x8x8x256xf32, #tpu.memory_space<vmem>>, vector<1x1x8x256xf32>
    %357 = vector.shape_cast %356 : vector<1x1x8x256xf32> to vector<8x256xf32>
    %358 = vector.shape_cast %354 : vector<8x256xf32> to vector<1x1x8x256xf32>
    tpu.vector_store %arg5[%c0_176, %355, %c0_177, %c0_178], %358 {strides = array<i32>} : memref<1x8x8x256xf32, #tpu.memory_space<vmem>>, vector<1x1x8x256xf32>,
    %c6_i32_179 = arith.constant 6 : i32
    %359 = arith.index_cast %c6_i32_179 : i32 to index
    %c0_180 = arith.constant 0 : index
    %c0_181 = arith.constant 0 : index
    %360 = vector.load %arg7[%359, %c0_180, %c0_181] : memref<8x8x256xf32, #tpu.memory_space<vmem>>, vector<1x8x256xf32>
    %361 = vector.shape_cast %360 : vector<1x8x256xf32> to vector<8x256xf32>
    %362 = arith.mulf %361, %350 : vector<8x256xf32>
    %363 = arith.index_cast %c6_i32_179 : i32 to index
    %c0_182 = arith.constant 0 : index
    %c0_183 = arith.constant 0 : index
    %364 = vector.load %arg8[%363, %c0_182, %c0_183] : memref<8x8x256xf32, #tpu.memory_space<vmem>>, vector<1x8x256xf32>
    %365 = vector.shape_cast %364 : vector<1x8x256xf32> to vector<8x256xf32>
    %366 = arith.addf %362, %365 : vector<8x256xf32>
    %367 = math.tanh %366 : vector<8x256xf32>
    %cst_184 = arith.constant 5.000000e-01 : f32
    %368 = vector.broadcast %cst_184 : f32 to vector<8x256xf32>
    %369 = arith.mulf %368, %367 : vector<8x256xf32>
    %cst_185 = arith.constant 5.000000e-01 : f32
    %370 = vector.broadcast %cst_185 : f32 to vector<8x256xf32>
    %371 = arith.addf %369, %370 : vector<8x256xf32>
    %c0_186 = arith.constant 0 : index
    %372 = arith.index_cast %c6_i32_179 : i32 to index
    %c0_187 = arith.constant 0 : index
    %c0_188 = arith.constant 0 : index
    %373 = vector.load %arg5[%c0_186, %372, %c0_187, %c0_188] : memref<1x8x8x256xf32, #tpu.memory_space<vmem>>, vector<1x1x8x256xf32>
    %374 = vector.shape_cast %373 : vector<1x1x8x256xf32> to vector<8x256xf32>
    %375 = vector.shape_cast %371 : vector<8x256xf32> to vector<1x1x8x256xf32>
    tpu.vector_store %arg5[%c0_186, %372, %c0_187, %c0_188], %375 {strides = array<i32>} : memref<1x8x8x256xf32, #tpu.memory_space<vmem>>, vector<1x1x8x256xf32>,
    %c7_i32_189 = arith.constant 7 : i32
    %376 = arith.index_cast %c7_i32_189 : i32 to index
    %c0_190 = arith.constant 0 : index
    %c0_191 = arith.constant 0 : index
    %377 = vector.load %arg7[%376, %c0_190, %c0_191] : memref<8x8x256xf32, #tpu.memory_space<vmem>>, vector<1x8x256xf32>
    %378 = vector.shape_cast %377 : vector<1x8x256xf32> to vector<8x256xf32>
    %379 = arith.mulf %378, %367 : vector<8x256xf32>
    %380 = arith.index_cast %c7_i32_189 : i32 to index
    %c0_192 = arith.constant 0 : index
    %c0_193 = arith.constant 0 : index
    %381 = vector.load %arg8[%380, %c0_192, %c0_193] : memref<8x8x256xf32, #tpu.memory_space<vmem>>, vector<1x8x256xf32>
    %382 = vector.shape_cast %381 : vector<1x8x256xf32> to vector<8x256xf32>
    %383 = arith.addf %379, %382 : vector<8x256xf32>
    %384 = math.tanh %383 : vector<8x256xf32>
    %cst_194 = arith.constant 5.000000e-01 : f32
    %385 = vector.broadcast %cst_194 : f32 to vector<8x256xf32>
    %386 = arith.mulf %385, %384 : vector<8x256xf32>
    %cst_195 = arith.constant 5.000000e-01 : f32
    %387 = vector.broadcast %cst_195 : f32 to vector<8x256xf32>
    %388 = arith.addf %386, %387 : vector<8x256xf32>
    %c0_196 = arith.constant 0 : index
    %389 = arith.index_cast %c7_i32_189 : i32 to index
    %c0_197 = arith.constant 0 : index
    %c0_198 = arith.constant 0 : index
    %390 = vector.load %arg5[%c0_196, %389, %c0_197, %c0_198] : memref<1x8x8x256xf32, #tpu.memory_space<vmem>>, vector<1x1x8x256xf32>
    %391 = vector.shape_cast %390 : vector<1x1x8x256xf32> to vector<8x256xf32>
    %392 = vector.shape_cast %388 : vector<8x256xf32> to vector<1x1x8x256xf32>
    tpu.vector_store %arg5[%c0_196, %389, %c0_197, %c0_198], %392 {strides = array<i32>} : memref<1x8x8x256xf32, #tpu.memory_space<vmem>>, vector<1x1x8x256xf32>,
    %c8_i32_199 = arith.constant 8 : i32
    %c0_200 = arith.constant 0 : index
    %c0_201 = arith.constant 0 : index
    %393 = vector.load %arg6[%c0_200, %c0_201] : memref<8x256xf32, #tpu.memory_space<vmem>>, vector<8x256xf32>
    tpu.vector_store %arg6[%c0_200, %c0_201], %384 {strides = array<i32>} : memref<8x256xf32, #tpu.memory_space<vmem>>, vector<8x256xf32>,
    return
  }
  func.func @transform_0(%arg0: i32, %arg1: i32) -> (i32, i32, i32, i32) {
    %c0_i32 = arith.constant 0 : i32
    %c0_i32_0 = arith.constant 0 : i32
    %c0_i32_1 = arith.constant 0 : i32
    return %arg0, %arg1, %c0_i32, %c0_i32_0 : i32, i32, i32, i32
  }
  func.func @transform_1(%arg0: i32, %arg1: i32) -> (i32, i32) {
    %c0_i32 = arith.constant 0 : i32
    %c0_i32_0 = arith.constant 0 : i32
    %c0_i32_1 = arith.constant 0 : i32
    return %c0_i32, %c0_i32_0 : i32, i32
  }
  func.func @transform_2(%arg0: i32, %arg1: i32) -> (i32, i32, i32) {
    %c0_i32 = arith.constant 0 : i32
    %c0_i32_0 = arith.constant 0 : i32
    %c0_i32_1 = arith.constant 0 : i32
    %c0_i32_2 = arith.constant 0 : i32
    return %c0_i32, %c0_i32_0, %c0_i32_1 : i32, i32, i32
  }
  func.func @transform_3(%arg0: i32, %arg1: i32) -> (i32, i32, i32, i32) {
    %c0_i32 = arith.constant 0 : i32
    %c0_i32_0 = arith.constant 0 : i32
    %c0_i32_1 = arith.constant 0 : i32
    return %arg0, %arg1, %c0_i32, %c0_i32_0 : i32, i32, i32, i32
  }
}

</mosaic_0001>

<bundles_post_ra>
// kernel: conv_ltc_forward.1
= control target key start
LH: loop header
LB: loop body
LE: loop exit
PB: predicated region body
PF: predicated region fallthrough
CT: control target
= control target key end

     0   :  { %s2060_s12 = smov 0   ;;  %s2062_s13 = smov 0   ;;  %s2433_s0 = inlined_call_operand.vmem [shape: bf16[2,16,72,256], index: 0, kind: input, shape index: {}]   ;;  %s2434_s1 = inlined_call_operand.vmem [shape: bf16[8,72], index: 1, kind: input, shape index: {}]   ;;  %s2435_s2 = inlined_call_operand.vmem [shape: f32[5,8,1], index: 2, kind: input, shape index: {}]   ;;  %s2436_s3 = inlined_call_operand.vmem [shape: f32[2,16,8,256], index: 3, kind: output, shape index: {}]  }
   0x1   :  { %s2064_s14 = smov 0   ;;  %s2066_s15 = smov 0  }
   0x2   :  { %s2068_s16 = smov 0  }
   0x3 LB: > { %s22_s17 = sadd.s32 1, %s2028_s14  ;;  %s25_s18 = sadd.s32 1, %s2032_s15  ;;  %s2036_s16 = sphi %s2068_s16, %s13_s16   ;;  %s2032_s15 = sphi %s2066_s15, %s2440_s15   ;;  %s2028_s14 = sphi %s2064_s14, %s2439_s14   ;;  %s2024_s13 = sphi %s2062_s13, %s2438_s13   ;;  %s2020_s12 = sphi %s2060_s12, %s2437_s12  }
   0x4   : > { %p23_p0 = scmp.ge.s32.totalorder %s22_s17, 2  ;;  %p1557_p1 = scmp.ge.s32.totalorder %s2036_s16, 1 }
   0x5   : > { %p159_p2 = scmp.lt.s32.totalorder %s2036_s16, 5 }
   0x6   : > { %s2442_s17 = smov (%p23_p0, %s22_s17), 0  ;;  %s2444_s18 = smov (!%p23_p0, %s25_s18), %s2032_s15 }
   0x7   : > { %p160_p3 = pnand %p1557_p1, %p159_p2  ;;  %p27_p4 = scmp.ge.s32.totalorder %s2444_s18, 2 }
   0x8   : > { %s1558_s19 = sshll.u32 (!%p160_p3), %s2020_s12, 3  ;;  %p194_p5 = scmp.lt.s32.totalorder (!%p160_p3), %s2024_s13, 1 }
   0x9   : > { %s2446_s18 = smov (%p27_p4, %s2444_s18), 0  ;;  %163 = sbr.rel (%p160_p3) target bundleno = 435 (0x1b3), region = 32 }
   0xa   : > { %p196_p6 = scmp.lt.s32.totalorder (!%p160_p3), %s1558_s19, 15  ;;  %p1564_p7 = scmp.ne.s32.totalorder (!%p160_p3), %s2020_s12, 0 }
   0xe   : > { %s2448_s13 = smov (!%p194_p5, %s2024_s13), 1  ;;  %s2450_s19 = smov (!%p196_p6, %s1558_s19), 15 }
   0xf   : > { %s1745_s20 = smul.u32 288, %s2448_s13  ;;  %s1562_s21 = sshll.u32 %s2448_s13, 5 }
  0x10   : > { %s1744_s22 = smul.u32 18, %s2450_s19  ;;  %s1561_s23 = sshll.u32 %s2450_s19, 1 }
  0x11   : > { %s211_s24 = sadd.s32 %s1562_s21, %s1561_s23  ;;  %219 = sbr.rel (%p1564_p7) target bundleno = 24 (0x18), region = 36 }
  0x12   : > { %s200_s25 = sadd.s32 %s1745_s20, %s1744_s22  ;;  %s1563_s26 = sshll.u32 %s211_s24, 3 }
  0x13   : > { %s1559_s27 = sshll.u32 %s200_s25, 2  ;;  %s2096_s30 = scalar_lea.vmem %s2436_s3, %s1563_s26 }
  0x14   : > { %s2101_s6 = scalar_lea.vmem %s2433_s0, %s1559_s27 }
  0x16   : > { %v2038_v0 = vmov -1.0  }
  0x17   : > { %220 = vst [vmem:[#allocation2] sm:$0xff] %v2038_v0  ;;  %221 = vst [vmem:[#allocation2 + $0x8] sm:$0xff] %v2038_v0 }
  0x18 PF: > { %v265_v1 = vld [vmem:[%s2101_s6 + $0x40] sm:$0xff]  ;;  %vm315_vm0 = vcmask 1043456   ;;  %v1589_v2 = vld [vmem:[%s2101_s6 + $0x88] sm:$0xff]  ;;  %v1794_v7 = vld [vmem:[%s2101_s6 + $0x34] ss:$8 sps:$4 sm:$0xff]   ;;  %v2039_v8 = vmov 0  }
  0x19   : > { %v1578_v3 = vcombine.high %v265_v1, %v265_v1  ;;  %v1599_v4 = vcombine.high %v1589_v2, %v1589_v2  ;;  %v1577_v5 = vcombine.low %v265_v1, %v265_v1  ;;  %v1598_v6 = vcombine.low %v1589_v2, %v1589_v2  ;;  %354 = vmatprep.mubr.bf16.mxu0 %v2039_v8  ;;  %v1796_v9 = vld [vmem:[%s2101_s6 + $0x7c] ss:$8 sps:$4 sm:$0xff]   ;;  %v1798_v12 = vld [vmem:[%s2101_s6 + $0x30] ss:$8 sps:$4 sm:$0xff]   ;;  %v1802_v15 = vld [vmem:[%s2101_s6 + $0x6c] ss:$8 sps:$4 sm:$0xff]  }
  0x1a   : > { %484 = vmatprep.mubr.bf16.mxu1 %v2039_v8  ;;  %1788 = vset.pattern.permute.xlu0 %v2039_v8  ;;  %v1799_v13 = vld [vmem:[%s2101_s6 + $0x78] ss:$8 sps:$4 sm:$0xff]   ;;  %v1800_v14 = vld [vmem:[%s2101_s6 + $0x24] ss:$8 sps:$4 sm:$0xff]   ;;  %v1805_v17 = vld [vmem:[%s2101_s6 + $0x68] ss:$8 sps:$4 sm:$0xff]  }
  0x1b   : > { %1579 = vmatprep.subr.msk.bf16.mxu0 %vm315_vm0, %v1578_v3  ;;  %1600 = vmatprep.subr.msk.bf16.mxu1 %vm315_vm0, %v1599_v4  ;;  %v317_v10 = vsel %vm315_vm0, %v1577_v5, 0  ;;  %v447_v11 = vsel %vm315_vm0, %v1598_v6, 0  ;;  %v1804_v16 = vld [vmem:[%s2101_s6 + $0x20] ss:$8 sps:$4 sm:$0xff]   ;;  %v1806_v18 = vld [vmem:[%s2101_s6 + $0x14] ss:$8 sps:$4 sm:$0xff]  }
  0x1c   : > { %329 = vmatpush1.bf16.msra.mxu0 %v317_v10  ;;  %459 = vmatpush1.bf16.msra.mxu1 %v447_v11  ;;  %v1808_v19 = vld [vmem:[%s2101_s6 + $0x5c] ss:$8 sps:$4 sm:$0xff]   ;;  %v1810_v20 = vld [vmem:[%s2101_s6 + $0x10] ss:$8 sps:$4 sm:$0xff]   ;;  %v1814_v23 = vld [vmem:[%s2101_s6 + $0x4c] ss:$8 sps:$4 sm:$0xff]  }
  0x1d   : > { %330 = vmatprep.subr.bf16.mxu0 %v1794_v7  ;;  %460 = vmatprep.subr.bf16.mxu1 %v1796_v9  ;;  %v1811_v21 = vld [vmem:[%s2101_s6 + $0x58] ss:$8 sps:$4 sm:$0xff]   ;;  %v1812_v22 = vld [vmem:[%s2101_s6 + $0x4] ss:$8 sps:$4 sm:$0xff]   ;;  %v1610_v24 = vld [vmem:[%s2101_s6 + $0xd0] sm:$0xff]  ;;  %vm311_vm1 = vcmask 588800  }
  0x1e   : > { %1789 = vset.pattern.permute.xlu1 %v2039_v8  ;;  %v1631_v25 = vld [vmem:[%s2101_s6 + $0x118] sm:$0xff]  ;;  %v1816_v26 = vld [vmem:[%s2101_s6] ss:$8 sps:$4 sm:$0xff]   ;;  %v1620_v28 = vcombine.high %v1610_v24, %v1610_v24  ;;  %v1619_v30 = vcombine.low %v1610_v24, %v1610_v24  ;;  %v1824_v33 = vld [vmem:[%s2101_s6 + $0xc4] ss:$8 sps:$4 sm:$0xff]  }
  0x1f   : > { %v1817_v27 = vld [vmem:[%s2101_s6 + $0x48] ss:$8 sps:$4 sm:$0xff]   ;;  %v1641_v29 = vcombine.high %v1631_v25, %v1631_v25  ;;  %v1640_v31 = vcombine.low %v1631_v25, %v1631_v25  ;;  %v2135_v32 = vld [vmem:[%s2434_s1] sm:$0xf]  ;;  %v1827_v36 = vld [vmem:[%s2101_s6 + $0x10c] ss:$8 sps:$4 sm:$0xff]  }
  0x20   : > { %331 = vmatpush1.bf16.msra.mxu0 %v1798_v12  ;;  %461 = vmatpush1.bf16.msra.mxu1 %v1799_v13  ;;  %v579_v34 = vsel %vm315_vm0, %v1619_v30, 0  ;;  %v1822_v37 = vld [vmem:[%s2101_s6 + $0xc0] ss:$8 sps:$4 sm:$0xff]   ;;  %v1830_v39 = vld [vmem:[%s2101_s6 + $0xb4] ss:$8 sps:$4 sm:$0xff]  }
  0x21   : > { %332 = vmatprep.subr.bf16.mxu0 %v1800_v14  ;;  %462 = vmatprep.subr.bf16.mxu1 %v1802_v15  ;;  %v711_v35 = vsel %vm315_vm0, %v1640_v31, 0  ;;  %v1825_v38 = vld [vmem:[%s2101_s6 + $0x108] ss:$8 sps:$4 sm:$0xff]   ;;  %v1833_v40 = vld [vmem:[%s2101_s6 + $0xfc] ss:$8 sps:$4 sm:$0xff]  }
  0x22   : > { %v1828_v41 = vld [vmem:[%s2101_s6 + $0xb0] ss:$8 sps:$4 sm:$0xff]   ;;  %v1836_v43 = vld [vmem:[%s2101_s6 + $0xa4] ss:$8 sps:$4 sm:$0xff]   ;;  %v1834_v45 = vld [vmem:[%s2101_s6 + $0xa0] ss:$8 sps:$4 sm:$0xff]  }
  0x23   : > { %v1831_v42 = vld [vmem:[%s2101_s6 + $0xf8] ss:$8 sps:$4 sm:$0xff]   ;;  %v1839_v44 = vld [vmem:[%s2101_s6 + $0xec] ss:$8 sps:$4 sm:$0xff]   ;;  %v1837_v46 = vld [vmem:[%s2101_s6 + $0xe8] ss:$8 sps:$4 sm:$0xff]  }
  0x24   : > { %333 = vmatpush1.bf16.msra.mxu0 %v1804_v16  ;;  %463 = vmatpush1.bf16.msra.mxu1 %v1805_v17  ;;  %v1842_v47 = vld [vmem:[%s2101_s6 + $0x94] ss:$8 sps:$4 sm:$0xff]   ;;  %v1652_v49 = vld [vmem:[%s2101_s6 + $0x160] sm:$0xff]  ;;  %v1673_v50 = vld [vmem:[%s2101_s6 + $0x1a8] sm:$0xff] }
  0x25   : > { %334 = vmatprep.subr.bf16.mxu0 %v1806_v18  ;;  %464 = vmatprep.subr.bf16.mxu1 %v1808_v19  ;;  %v1845_v48 = vld [vmem:[%s2101_s6 + $0xdc] ss:$8 sps:$4 sm:$0xff]   ;;  %v1840_v51 = vld [vmem:[%s2101_s6 + $0x90] ss:$8 sps:$4 sm:$0xff]   ;;  %v1662_v53 = vcombine.high %v1652_v49, %v1652_v49  ;;  %v1683_v54 = vcombine.high %v1673_v50, %v1673_v50  ;;  %v1661_v55 = vcombine.low %v1652_v49, %v1652_v49  ;;  %v1861_v0 = vld [vmem:[%s2101_s6 + $0x18c] ss:$8 sps:$4 sm:$0xff]  }
  0x26   : > { %v1843_v52 = vld [vmem:[%s2101_s6 + $0xd8] ss:$8 sps:$4 sm:$0xff]   ;;  %v1682_v56 = vcombine.low %v1673_v50, %v1673_v50  ;;  %v1852_v57 = vld [vmem:[%s2101_s6 + $0x154] ss:$8 sps:$4 sm:$0xff]   ;;  %v1858_v63 = vld [vmem:[%s2101_s6 + $0x144] ss:$8 sps:$4 sm:$0xff]  }
  0x27   : > { %v843_v58 = vsel %vm315_vm0, %v1661_v55, 0  ;;  %v1855_v60 = vld [vmem:[%s2101_s6 + $0x19c] ss:$8 sps:$4 sm:$0xff]   ;;  %v1850_v61 = vld [vmem:[%s2101_s6 + $0x150] ss:$8 sps:$4 sm:$0xff]   ;;  %v1565_v2 = vld [vmem:[%s2435_s2 + $0x8] sm:$0xff] }
  0x28   : > { %335 = vmatpush1.bf16.msra.mxu0 %v1810_v20  ;;  %465 = vmatpush1.bf16.msra.mxu1 %v1811_v21  ;;  %v975_v59 = vsel %vm315_vm0, %v1682_v56, 0  ;;  %v1853_v62 = vld [vmem:[%s2101_s6 + $0x198] ss:$8 sps:$4 sm:$0xff]   ;;  %v1859_v4 = vld [vmem:[%s2101_s6 + $0x188] ss:$8 sps:$4 sm:$0xff]  }
  0x29   : > { %336 = vmatprep.subr.bf16.mxu0 %v1812_v22  ;;  %466 = vmatprep.subr.bf16.mxu1 %v1814_v23  ;;  %v1568_v1 = vld [vmem:[%s2435_s2 + $0x20] sm:$0xff]  ;;  %v1864_v6 = vld [vmem:[%s2101_s6 + $0x134] ss:$8 sps:$4 sm:$0xff]   ;;  %v1862_v10 = vld [vmem:[%s2101_s6 + $0x130] ss:$8 sps:$4 sm:$0xff]  }
  0x2a   : > { %253 = vperm.xlu0 %1788, %v1568_v1   ;;  %v1856_v3 = vld [vmem:[%s2101_s6 + $0x140] ss:$8 sps:$4 sm:$0xff]   ;;  %v1867_v7 = vld [vmem:[%s2101_s6 + $0x17c] ss:$8 sps:$4 sm:$0xff]   ;;  %232 = vperm.xlu1 %1789, %v1565_v2   ;;  %v1566_v9 = vld [vmem:[%s2435_s2 + $0x10] sm:$0xff] }
  0x2b   : > { %v222_v5 = vld [vmem:[%s2435_s2] sm:$0xff]  ;;  %v1567_v12 = vld [vmem:[%s2435_s2 + $0x18] sm:$0xff]  ;;  %v1873_v14 = vld [vmem:[%s2101_s6 + $0x16c] ss:$8 sps:$4 sm:$0xff]  }
  0x2c   : > { %337 = vmatpush1.bf16.msra.mxu0 %v1816_v26  ;;  %467 = vmatpush1.bf16.msra.mxu1 %v1817_v27  ;;  %v1865_v11 = vld [vmem:[%s2101_s6 + $0x178] ss:$8 sps:$4 sm:$0xff]   ;;  %v1870_v13 = vld [vmem:[%s2101_s6 + $0x124] ss:$8 sps:$4 sm:$0xff]   ;;  %v1694_v15 = vld [vmem:[%s2101_s6 + $0x1f0] sm:$0xff] }
  0x2d   : > { %1621 = vmatprep.subr.msk.bf16.mxu0 %vm315_vm0, %v1620_v28  ;;  %1642 = vmatprep.subr.msk.bf16.mxu1 %vm315_vm0, %v1641_v29  ;;  %v1715_v16 = vld [vmem:[%s2101_s6 + $0x238] sm:$0xff]  ;;  %v1868_v17 = vld [vmem:[%s2101_s6 + $0x120] ss:$8 sps:$4 sm:$0xff]   ;;  %v1704_v19 = vcombine.high %v1694_v15, %v1694_v15  ;;  %v1703_v21 = vcombine.low %v1694_v15, %v1694_v15  ;;  %v1880_v25 = vld [vmem:[%s2101_s6 + $0x1e4] ss:$8 sps:$4 sm:$0xff]  }
  0x2e   : > { %225 = vperm.xlu0 %1788, %v222_v5   ;;  %239 = vperm.xlu1 %1789, %v1566_v9   ;;  %v1871_v18 = vld [vmem:[%s2101_s6 + $0x168] ss:$8 sps:$4 sm:$0xff]   ;;  %v1725_v20 = vcombine.high %v1715_v16, %v1715_v16  ;;  %v1724_v22 = vcombine.low %v1715_v16, %v1715_v16  ;;  %v1883_v26 = vld [vmem:[%s2101_s6 + $0x22c] ss:$8 sps:$4 sm:$0xff]   ;;  %v1889_v30 = vld [vmem:[%s2101_s6 + $0x21c] ss:$8 sps:$4 sm:$0xff]  }
  0x2f   : > { %1580 = vmatmul.mubr.msk.bf16.vlgmr.msra.gmra.mxu0 %vm311_vm1, %v2135_v32  ;;  %1601 = vmatmul.mubr.msk.bf16.vlgmr.msra.gmra.mxu1 %vm311_vm1, %v2135_v32  ;;  %v1107_v23 = vsel %vm315_vm0, %v1703_v21, 0  ;;  %v1878_v27 = vld [vmem:[%s2101_s6 + $0x1e0] ss:$8 sps:$4 sm:$0xff]   ;;  %v1886_v29 = vld [vmem:[%s2101_s6 + $0x1d4] ss:$8 sps:$4 sm:$0xff]  }
  0x30   : > { %591 = vmatpush1.bf16.msra.mxu0 %v579_v34  ;;  %723 = vmatpush1.bf16.msra.mxu1 %v711_v35  ;;  %v1239_v24 = vsel %vm315_vm0, %v1724_v22, 0  ;;  %v1881_v28 = vld [vmem:[%s2101_s6 + $0x228] ss:$8 sps:$4 sm:$0xff]   ;;  %v1892_v34 = vld [vmem:[%s2101_s6 + $0x1c4] ss:$8 sps:$4 sm:$0xff]  }
  0x31   : > { %592 = vmatprep.subr.bf16.mxu0 %v1824_v33  ;;  %724 = vmatprep.subr.bf16.mxu1 %v1827_v36  ;;  %v1884_v31 = vld [vmem:[%s2101_s6 + $0x1d0] ss:$8 sps:$4 sm:$0xff]   ;;  %v1895_v35 = vld [vmem:[%s2101_s6 + $0x20c] ss:$8 sps:$4 sm:$0xff]   ;;  %v1890_v36 = vld [vmem:[%s2101_s6 + $0x1c0] ss:$8 sps:$4 sm:$0xff]  }
  0x32   : > { %616 = vmatprep.mubr.bf16.mxu0 %v2039_v8  ;;  %748 = vmatprep.mubr.bf16.mxu1 %v2039_v8  ;;  %v1887_v33 = vld [vmem:[%s2101_s6 + $0x218] ss:$8 sps:$4 sm:$0xff]  }
  0x33   : > { %246 = vperm.xlu0 %1788, %v1567_v12  }
  0x34   : > { %593 = vmatpush1.bf16.msra.mxu0 %v1822_v37  ;;  %725 = vmatpush1.bf16.msra.mxu1 %v1825_v38  ;;  %v1893_v37 = vld [vmem:[%s2101_s6 + $0x208] ss:$8 sps:$4 sm:$0xff]   ;;  %v1898_v38 = vld [vmem:[%s2101_s6 + $0x1b4] ss:$8 sps:$4 sm:$0xff]  }
  0x35   : > { %594 = vmatprep.subr.bf16.mxu0 %v1830_v39  ;;  %726 = vmatprep.subr.bf16.mxu1 %v1833_v40  ;;  %v1901_v39 = vld [vmem:[%s2101_s6 + $0x1fc] ss:$8 sps:$4 sm:$0xff]   ;;  %v1899_v40 = vld [vmem:[%s2101_s6 + $0x1f8] ss:$8 sps:$4 sm:$0xff]  }
  0x38   : > { %595 = vmatpush1.bf16.msra.mxu0 %v1828_v41  ;;  %727 = vmatpush1.bf16.msra.mxu1 %v1831_v42 }
  0x39   : > { %596 = vmatprep.subr.bf16.mxu0 %v1836_v43  ;;  %728 = vmatprep.subr.bf16.mxu1 %v1839_v44 }
  0x3c   : > { %597 = vmatpush1.bf16.msra.mxu0 %v1834_v45  ;;  %729 = vmatpush1.bf16.msra.mxu1 %v1837_v46 }
  0x3d   : > { %598 = vmatprep.subr.bf16.mxu0 %v1842_v47  ;;  %730 = vmatprep.subr.bf16.mxu1 %v1845_v48 }
  0x40   : > { %599 = vmatpush1.bf16.msra.mxu0 %v1840_v51  ;;  %731 = vmatpush1.bf16.msra.mxu1 %v1843_v52 }
  0x41   : > { %1663 = vmatprep.subr.msk.bf16.mxu0 %vm315_vm0, %v1662_v53  ;;  %1684 = vmatprep.subr.msk.bf16.mxu1 %vm315_vm0, %v1683_v54 }
  0x43   : > { %1622 = vmatmul.mubr.msk.bf16.vlgmr.msra.gmra.mxu0 %vm311_vm1, %v2135_v32  ;;  %1643 = vmatmul.mubr.msk.bf16.vlgmr.msra.gmra.mxu1 %vm311_vm1, %v2135_v32 }
  0x44   : > { %855 = vmatpush1.bf16.msra.mxu0 %v843_v58  ;;  %987 = vmatpush1.bf16.msra.mxu1 %v975_v59 }
  0x45   : > { %856 = vmatprep.subr.bf16.mxu0 %v1852_v57  ;;  %988 = vmatprep.subr.bf16.mxu1 %v1855_v60 }
  0x46   : > { %880 = vmatprep.mubr.bf16.mxu0 %v2039_v8  ;;  %1012 = vmatprep.mubr.bf16.mxu1 %v2039_v8 }
  0x48   : > { %857 = vmatpush1.bf16.msra.mxu0 %v1850_v61  ;;  %989 = vmatpush1.bf16.msra.mxu1 %v1853_v62 }
  0x49   : > { %858 = vmatprep.subr.bf16.mxu0 %v1858_v63  ;;  %990 = vmatprep.subr.bf16.mxu1 %v1861_v0 }
  0x4c   : > { %859 = vmatpush1.bf16.msra.mxu0 %v1856_v3  ;;  %991 = vmatpush1.bf16.msra.mxu1 %v1859_v4 }
  0x4d   : > { %860 = vmatprep.subr.bf16.mxu0 %v1864_v6  ;;  %992 = vmatprep.subr.bf16.mxu1 %v1867_v7 }
  0x50   : > { %861 = vmatpush1.bf16.msra.mxu0 %v1862_v10  ;;  %993 = vmatpush1.bf16.msra.mxu1 %v1865_v11 }
  0x51   : > { %862 = vmatprep.subr.bf16.mxu0 %v1870_v13  ;;  %994 = vmatprep.subr.bf16.mxu1 %v1873_v14 }
  0x54   : > { %863 = vmatpush1.bf16.msra.mxu0 %v1868_v17  ;;  %995 = vmatpush1.bf16.msra.mxu1 %v1871_v18 }
  0x55   : > { %1705 = vmatprep.subr.msk.bf16.mxu0 %vm315_vm0, %v1704_v19  ;;  %1726 = vmatprep.subr.msk.bf16.mxu1 %vm315_vm0, %v1725_v20 }
  0x57   : > { %1664 = vmatmul.mubr.msk.bf16.vlgmr.msra.gmra.mxu0 %vm311_vm1, %v2135_v32  ;;  %1685 = vmatmul.mubr.msk.bf16.vlgmr.msra.gmra.mxu1 %vm311_vm1, %v2135_v32 }
  0x58   : > { %1119 = vmatpush1.bf16.msra.mxu0 %v1107_v23  ;;  %1251 = vmatpush1.bf16.msra.mxu1 %v1239_v24 }
  0x59   : > { %1120 = vmatprep.subr.bf16.mxu0 %v1880_v25  ;;  %1252 = vmatprep.subr.bf16.mxu1 %v1883_v26 }
  0x5a   : > { %1144 = vmatprep.mubr.bf16.mxu0 %v2039_v8  ;;  %1276 = vmatprep.mubr.bf16.mxu1 %v2039_v8  ;;  %v1896_v8 = vld [vmem:[%s2101_s6 + $0x1b0] ss:$8 sps:$4 sm:$0xff]  }
  0x5c   : > { %1121 = vmatpush1.bf16.msra.mxu0 %v1878_v27  ;;  %1253 = vmatpush1.bf16.msra.mxu1 %v1881_v28 }
  0x5d   : > { %1122 = vmatprep.subr.bf16.mxu0 %v1886_v29  ;;  %1254 = vmatprep.subr.bf16.mxu1 %v1889_v30 }
  0x60   : > { %1123 = vmatpush1.bf16.msra.mxu0 %v1884_v31  ;;  %1255 = vmatpush1.bf16.msra.mxu1 %v1887_v33 }
  0x61   : > { %1124 = vmatprep.subr.bf16.mxu0 %v1892_v34  ;;  %1256 = vmatprep.subr.bf16.mxu1 %v1895_v35 }
  0x64   : > { %1125 = vmatpush1.bf16.msra.mxu0 %v1890_v36  ;;  %1257 = vmatpush1.bf16.msra.mxu1 %v1893_v37 }
  0x65   : > { %1126 = vmatprep.subr.bf16.mxu0 %v1898_v38  ;;  %1258 = vmatprep.subr.bf16.mxu1 %v1901_v39 }
  0x68   : > { %1127 = vmatpush1.bf16.msra.mxu0 %v1896_v8  ;;  %1259 = vmatpush1.bf16.msra.mxu1 %v1899_v40 }
  0x6b   : > { %1706 = vmatmul.mubr.msk.bf16.vlgmr.msra.gmra.mxu0 %vm311_vm1, %v2135_v32  ;;  %1727 = vmatmul.mubr.msk.bf16.vlgmr.msra.gmra.mxu1 %vm311_vm1, %v2135_v32 }
  0xa5   : > { %v2238_v41 = vpop.permute.xlu0 %253  ;;  %v2257_v11 = vpop.permute.xlu1 %232 }
  0xa9   : > { %v2250_v0 = vpop.permute.xlu0 %225  ;;  %v2280_v35 = vpop.permute.xlu1 %239 }
  0xae   : > { %v2272_v28 = vpop.permute.xlu0 %246 }
  0xef   : > { %v356_v42 = vpop.f32.mrf.mxu0  ;;  %v486_v43 = vpop.f32.mrf.mxu1 }
  0xf0   : > { %v357_v44 = vadd.f32 %v356_v42, %v2238_v41  ;;  %v2242_v45 = vadd.f32 %v486_v43, %v2238_v41 }
  0xf1   : > { %v358_v46 = vpop.f32.mrf.mxu0  ;;  %v488_v47 = vpop.f32.mrf.mxu1 }
  0xf2   : > { %v363_v48 = vmul.f32 0.5, %v357_v44  ;;  %v493_v49 = vmul.f32 0.5, %v2242_v45  ;;  %v359_v50 = vadd.f32 %v358_v46, %v2238_v41  ;;  %v2247_v51 = vadd.f32 %v488_v47, %v2238_v41  ;;  %v1315_v46 = vld [vmem:[#allocation2] sm:$0xff] }
  0xf3   : > { %v360_v32 = vpop.f32.mrf.mxu0  ;;  %v490_v52 = vpop.f32.mrf.mxu1  ;;  %v383_v33 = vmul.f32 %v357_v44, %v2272_v28 }
  0xf4   : > { %1902 = vtanh.f32 %v363_v48  ;;  %v364_v53 = vmul.f32 0.5, %v359_v50  ;;  %v494_v54 = vmul.f32 0.5, %v2247_v51  ;;  %v384_v37 = vmul.f32 %v359_v50, %v2272_v28 }
  0xf5   : > { %1904 = vtanh.f32 %v493_v49  ;;  %v361_v55 = vpop.f32.mrf.mxu0  ;;  %v491_v56 = vpop.f32.mrf.mxu1  ;;  %v385_v48 = vmul.f32 0.5, %v383_v33 }
  0xf6   : > { %1906 = vtanh.f32 %v364_v53  ;;  %v386_v52 = vmul.f32 0.5, %v384_v37 }
  0xf7   : > { %1908 = vtanh.f32 %v494_v54  ;;  %v1316_v54 = vld [vmem:[#allocation2 + $0x8] sm:$0xff] }
 0x101   : > { %v1903_v57 = vpop.eup %1902 }
 0x102   : > { %v1905_v58 = vpop.eup %1904  ;;  %v367_v59 = vmul.f32 0.5, %v1903_v57 }
 0x103   : > { %v1907_v60 = vpop.eup %1906  ;;  %v618_v61 = vpop.f32.mrf.mxu0  ;;  %v497_v7 = vmul.f32 0.5, %v1905_v58 }
 0x104   : > { %v750_v62 = vpop.f32.mrf.mxu1  ;;  %v1909_v63 = vpop.eup %1908  ;;  %v369_v1 = vadd.f32 0.5, %v367_v59  ;;  %v368_v2 = vmul.f32 0.5, %v1907_v60  ;;  %v2253_v3 = vadd.f32 %v618_v61, %v2238_v41 }
 0x105   : > { %v620_v4 = vpop.f32.mrf.mxu0  ;;  %v498_v12 = vmul.f32 0.5, %v1909_v63  ;;  %v499_v19 = vadd.f32 0.5, %v497_v7  ;;  %v2269_v26 = vadd.f32 %v750_v62, %v2238_v41 }
 0x106   : > { %v752_v5 = vpop.f32.mrf.mxu1  ;;  %v371_v6 = vmul.f32 %v369_v1, %v2250_v0  ;;  %v370_v9 = vadd.f32 0.5, %v368_v2  ;;  %v625_v10 = vmul.f32 0.5, %v2253_v3  ;;  %v2263_v21 = vadd.f32 %v620_v4, %v2238_v41 }
 0x107   : > { %v622_v13 = vpop.f32.mrf.mxu0  ;;  %v500_v22 = vadd.f32 0.5, %v498_v12  ;;  %v501_v24 = vmul.f32 %v499_v19, %v2250_v0  ;;  %v2276_v30 = vadd.f32 %v752_v5, %v2238_v41  ;;  %v757_v34 = vmul.f32 0.5, %v2269_v26 }
 0x108   : > { %v754_v14 = vpop.f32.mrf.mxu1  ;;  %v372_v15 = vmul.f32 %v370_v9, %v2250_v0  ;;  %1910 = vtanh.f32 %v625_v10  ;;  %v373_v16 = vadd.f32 %v371_v6, %v2257_v11  ;;  %v626_v23 = vmul.f32 0.5, %v2263_v21 }
 0x109   : > { %v623_v17 = vpop.f32.mrf.mxu0  ;;  %v502_v25 = vmul.f32 %v500_v22, %v2250_v0  ;;  %v503_v27 = vadd.f32 %v501_v24, %v2257_v11  ;;  %v758_v39 = vmul.f32 0.5, %v2276_v30 }
 0x10a   : > { %v755_v18 = vpop.f32.mrf.mxu1  ;;  %v374_v20 = vadd.f32 %v372_v15, %v2257_v11  ;;  %1912 = vrcp.f32 %v373_v16 }
 0x10b   : > { %v504_v29 = vadd.f32 %v502_v25, %v2257_v11 }
 0x10c   : > { %1914 = vrcp.f32 %v374_v20  ;;  %v514_v20 = vmul.f32 %v2242_v45, %v2272_v28 }
 0x10d   : > { %1916 = vtanh.f32 %v626_v23  ;;  %v515_v23 = vmul.f32 %v2247_v51, %v2272_v28 }
 0x10e   : > { %1918 = vrcp.f32 %v503_v27 }
 0x10f   : > { %1920 = vrcp.f32 %v504_v29  ;;  %v517_v37 = vmul.f32 0.5, %v515_v23 }
 0x110   : > { %1922 = vtanh.f32 %v757_v34 }
 0x111   : > { %1924 = vtanh.f32 %v758_v39 }
 0x115   : > { %v1911_v31 = vpop.eup %1910 }
 0x116   : > { %v629_v38 = vmul.f32 0.5, %v1911_v31 }
 0x117   : > { %v1913_v36 = vpop.eup %1912  ;;  %v882_v8 = vpop.f32.mrf.mxu0 }
 0x118   : > { %v2284_v40 = vpop.f32.mrf.mxu1  ;;  %v376_v42 = vmul.f32 %v1913_v36, %v2280_v35  ;;  %v631_v53 = vadd.f32 0.5, %v629_v38  ;;  %v2294_v13 = vadd.f32 %v882_v8, %v2238_v41  ;;  %v516_v36 = vmul.f32 0.5, %v514_v20 }
 0x119   : > { %v1915_v43 = vpop.eup %1914  ;;  %v884_v44 = vpop.f32.mrf.mxu0 }
 0x11a   : > { %v2287_v47 = vpop.f32.mrf.mxu1  ;;  %v378_v49 = vmul.f32 %v1915_v43, %v2280_v35  ;;  %v379_v32 = vmul.f32 0.25, %v376_v42  ;;  %v1917_v50 = vpop.eup %1916  ;;  %v633_v5 = vmul.f32 %v631_v53, %v2250_v0  ;;  %v2298_v15 = vadd.f32 %v884_v44, %v2238_v41 }
 0x11b   : > { %v886_v55 = vpop.f32.mrf.mxu0  ;;  %v630_v57 = vmul.f32 0.5, %v1917_v50  ;;  %v1919_v9 = vpop.eup %1918  ;;  %v889_v22 = vmul.f32 0.5, %v2294_v13 }
 0x11c   : > { %v1018_v56 = vpop.f32.mrf.mxu1  ;;  %v380_v58 = vmul.f32 0.25, %v378_v49  ;;  %v387_v59 = vadd.f32 %v385_v48, %v379_v32  ;;  %v1319_v60 = vmul.f32 %v1315_v46, %v379_v32  ;;  %v1921_v10 = vpop.eup %1920  ;;  %v635_v12 = vadd.f32 %v633_v5, %v2257_v11 }
 0x11d   : > { %v887_v61 = vpop.f32.mrf.mxu0  ;;  %v632_v63 = vadd.f32 0.5, %v630_v57  ;;  %v506_v16 = vmul.f32 %v1919_v9, %v2280_v35  ;;  %v1923_v17 = vpop.eup %1922  ;;  %v508_v18 = vmul.f32 %v1921_v10, %v2280_v35  ;;  %v890_v24 = vmul.f32 0.5, %v2298_v15 }
 0x11e   : > { %v1019_v62 = vpop.f32.mrf.mxu1  ;;  %v388_v1 = vadd.f32 %v386_v52, %v380_v58  ;;  %v1320_v2 = vmul.f32 %v1316_v54, %v380_v58  ;;  %v1323_v4 = vadd.f32 %v1319_v60, %v387_v59  ;;  %v1925_v19 = vpop.eup %1924  ;;  %v761_v25 = vmul.f32 0.5, %v1923_v17 }
 0x11f   : > { %v634_v7 = vmul.f32 %v632_v63, %v2250_v0  ;;  %v509_v27 = vmul.f32 0.25, %v506_v16  ;;  %v762_v29 = vmul.f32 0.5, %v1925_v19  ;;  %v510_v31 = vmul.f32 0.25, %v508_v18 }
 0x120   : > { %v1324_v6 = vadd.f32 %v1320_v2, %v388_v1  ;;  %1926 = vtanh.f32 %v1323_v4  ;;  %v763_v51 = vadd.f32 0.5, %v761_v25  ;;  %v2323_v1 = vadd.f32 %v2284_v40, %v2238_v41 }
 0x121   : > { %v636_v14 = vadd.f32 %v634_v7, %v2257_v11  ;;  %v518_v42 = vadd.f32 %v516_v36, %v509_v27  ;;  %v764_v44 = vadd.f32 0.5, %v762_v29  ;;  %v519_v48 = vadd.f32 %v517_v37, %v510_v31 }
 0x122   : > { %1928 = vtanh.f32 %v1324_v6  ;;  %v765_v57 = vmul.f32 %v763_v51, %v2250_v0  ;;  %v2328_v4 = vadd.f32 %v2287_v47, %v2238_v41  ;;  %v646_v10 = vmul.f32 %v2253_v3, %v2272_v28 }
 0x123   : > { %1930 = vrcp.f32 %v635_v12  ;;  %v766_v60 = vmul.f32 %v764_v44, %v2250_v0  ;;  %v1021_v12 = vmul.f32 0.5, %v2323_v1  ;;  %v647_v40 = vmul.f32 %v2263_v21, %v2272_v28 }
 0x124   : > { %1932 = vrcp.f32 %v636_v14  ;;  %v767_v63 = vadd.f32 %v765_v57, %v2257_v11  ;;  %v1022_v14 = vmul.f32 0.5, %v2328_v4  ;;  %v648_v19 = vmul.f32 0.5, %v646_v10 }
 0x125   : > { %1934 = vtanh.f32 %v889_v22  ;;  %v768_v2 = vadd.f32 %v766_v60, %v2257_v11  ;;  %v649_v22 = vmul.f32 0.5, %v647_v40 }
 0x126   : > { %1936 = vtanh.f32 %v890_v24 }
 0x12b   : > { %v2308_v33 = vpop.f32.mrf.mxu0  ;;  %v2310_v34 = vpop.f32.mrf.mxu1 }
 0x12d   : > { %v1927_v45 = vpop.eup %1926  ;;  %v2312_v38 = vpop.f32.mrf.mxu0 }
 0x12e   : > { %v2314_v39 = vpop.f32.mrf.mxu1  ;;  %v1327_v8 = vmul.f32 0.5, %v1927_v45  ;;  %v1335_v43 = vmul.f32 %v1927_v45, %v509_v27 }
 0x12f   : > { %v1929_v46 = vpop.eup %1928  ;;  %v1150_v49 = vpop.f32.mrf.mxu0 }
 0x130   : > { %v1282_v32 = vpop.f32.mrf.mxu1  ;;  %v1328_v50 = vmul.f32 0.5, %v1929_v46  ;;  %v1329_v52 = vadd.f32 0.5, %v1327_v8  ;;  %v1339_v53 = vadd.f32 %v1335_v43, %v518_v42  ;;  %v1336_v54 = vmul.f32 %v1929_v46, %v510_v31  ;;  %v1931_v61 = vpop.eup %1930 }
 0x131   : > { %v1151_v55 = vpop.f32.mrf.mxu0  ;;  %v1933_v62 = vpop.eup %1932  ;;  %v638_v5 = vmul.f32 %v1931_v61, %v2280_v35  ;;  %v2345_v49 = vadd.f32 %v2308_v33, %v2238_v41  ;;  %v779_v33 = vmul.f32 %v2276_v30, %v2272_v28 }
 0x132   : > { %v1283_v56 = vpop.f32.mrf.mxu1  ;;  %v1330_v58 = vadd.f32 0.5, %v1328_v50  ;;  %1331 = vst [vmem:[%s2096_s30] sm:$0xff] %v1329_v52  ;;  %1938 = vtanh.f32 %v1339_v53  ;;  %v1340_v59 = vadd.f32 %v1336_v54, %v519_v48  ;;  %v1935_v6 = vpop.eup %1934  ;;  %v640_v7 = vmul.f32 %v1933_v62, %v2280_v35 }
 0x133   : > { %v1937_v9 = vpop.eup %1936  ;;  %v641_v47 = vmul.f32 0.25, %v638_v5  ;;  %v893_v16 = vmul.f32 0.5, %v1935_v6  ;;  %v2350_v50 = vadd.f32 %v2312_v38, %v2238_v41  ;;  %v778_v56 = vmul.f32 %v2269_v26, %v2272_v28 }
 0x134   : > { %1332 = vst [vmem:[%s2096_s30 + $0x8] sm:$0xff] %v1330_v58  ;;  %1940 = vtanh.f32 %v1340_v59  ;;  %v642_v17 = vmul.f32 0.25, %v640_v7  ;;  %v894_v18 = vmul.f32 0.5, %v1937_v9  ;;  %v1153_v57 = vmul.f32 0.5, %v2345_v49 }
 0x135   : > { %1942 = vrcp.f32 %v767_v63  ;;  %v650_v3 = vadd.f32 %v648_v19, %v641_v47  ;;  %v895_v23 = vadd.f32 0.5, %v893_v16  ;;  %v1154_v58 = vmul.f32 0.5, %v2350_v50 }
 0x136   : > { %1944 = vrcp.f32 %v768_v2  ;;  %v651_v21 = vadd.f32 %v649_v22, %v642_v17  ;;  %v896_v29 = vadd.f32 0.5, %v894_v18  ;;  %v780_v62 = vmul.f32 0.5, %v778_v56 }
 0x137   : > { %1946 = vtanh.f32 %v1021_v12  ;;  %v897_v51 = vmul.f32 %v895_v23, %v2250_v0  ;;  %v781_v2 = vmul.f32 0.5, %v779_v33  ;;  %v2367_v23 = vadd.f32 %v2310_v34, %v2238_v41 }
 0x138   : > { %1948 = vtanh.f32 %v1022_v14  ;;  %v898_v43 = vmul.f32 %v896_v29, %v2250_v0  ;;  %v911_v34 = vmul.f32 %v2298_v15, %v2272_v28 }
 0x139   : > { %v899_v48 = vadd.f32 %v897_v51, %v2257_v11 }
 0x13a   : > { %v900_v32 = vadd.f32 %v898_v43, %v2257_v11 }
 0x13f   : > { %v1939_v20 = vpop.eup %1938 }
 0x140   : > { %v1343_v24 = vmul.f32 0.5, %v1939_v20  ;;  %v1352_v25 = vmul.f32 %v1939_v20, %v641_v47 }
 0x141   : > { %v1941_v27 = vpop.eup %1940 }
 0x142   : > { %v1345_v31 = vadd.f32 0.5, %v1343_v24  ;;  %v1356_v36 = vadd.f32 %v1352_v25, %v650_v3  ;;  %v1344_v45 = vmul.f32 0.5, %v1941_v27  ;;  %v1353_v37 = vmul.f32 %v1941_v27, %v642_v17  ;;  %v1943_v46 = vpop.eup %1942 }
 0x143   : > { %v1945_v44 = vpop.eup %1944  ;;  %v770_v52 = vmul.f32 %v1943_v46, %v2280_v35  ;;  %v2372_v25 = vadd.f32 %v2314_v39, %v2238_v41  ;;  %v913_v46 = vmul.f32 0.5, %v911_v34 }
 0x144   : > { %1728 = vst [vmem:[%s2096_s30 + $0x10] sm:$0xff] %v1345_v31  ;;  %1950 = vtanh.f32 %v1356_v36  ;;  %v1346_v8 = vadd.f32 0.5, %v1344_v45  ;;  %v1357_v42 = vadd.f32 %v1353_v37, %v651_v21  ;;  %v1947_v53 = vpop.eup %1946  ;;  %v772_v54 = vmul.f32 %v1945_v44, %v2280_v35 }
 0x145   : > { %v1949_v55 = vpop.eup %1948  ;;  %v773_v38 = vmul.f32 0.25, %v770_v52  ;;  %v1025_v59 = vmul.f32 0.5, %v1947_v53  ;;  %v910_v36 = vmul.f32 %v2294_v13, %v2272_v28  ;;  %v1285_v45 = vmul.f32 0.5, %v2367_v23 }
 0x146   : > { %1729 = vst [vmem:[%s2096_s30 + $0x18] sm:$0xff] %v1346_v8  ;;  %1952 = vtanh.f32 %v1357_v42  ;;  %v774_v60 = vmul.f32 0.25, %v772_v54  ;;  %v1026_v61 = vmul.f32 0.5, %v1949_v55  ;;  %v1286_v37 = vmul.f32 0.5, %v2372_v25 }
 0x147   : > { %1954 = vrcp.f32 %v899_v48  ;;  %v782_v26 = vadd.f32 %v780_v62, %v773_v38  ;;  %v1027_v7 = vadd.f32 0.5, %v1025_v59  ;;  %v912_v42 = vmul.f32 0.5, %v910_v36 }
 0x148   : > { %1956 = vrcp.f32 %v900_v32  ;;  %v783_v30 = vadd.f32 %v781_v2, %v774_v60  ;;  %v1028_v10 = vadd.f32 0.5, %v1026_v61 }
 0x149   : > { %1958 = vtanh.f32 %v1153_v57  ;;  %v1029_v16 = vmul.f32 %v1027_v7, %v2250_v0  ;;  %v1042_v7 = vmul.f32 %v2323_v1, %v2272_v28 }
 0x14a   : > { %1960 = vtanh.f32 %v1154_v58  ;;  %v1030_v19 = vmul.f32 %v1028_v10, %v2250_v0 }
 0x14b   : > { %v1031_v3 = vadd.f32 %v1029_v16, %v2257_v11 }
 0x14c   : > { %v1032_v24 = vadd.f32 %v1030_v19, %v2257_v11 }
 0x151   : > { %v1951_v63 = vpop.eup %1950 }
 0x152   : > { %v1360_v5 = vmul.f32 0.5, %v1951_v63  ;;  %v1369_v6 = vmul.f32 %v1951_v63, %v773_v38 }
 0x153   : > { %v1953_v9 = vpop.eup %1952 }
 0x154   : > { %v1362_v12 = vadd.f32 0.5, %v1360_v5  ;;  %v1373_v40 = vadd.f32 %v1369_v6, %v782_v26  ;;  %v1361_v14 = vmul.f32 0.5, %v1953_v9  ;;  %v1370_v47 = vmul.f32 %v1953_v9, %v774_v60  ;;  %v1955_v20 = vpop.eup %1954 }
 0x155   : > { %v1957_v22 = vpop.eup %1956  ;;  %v902_v27 = vmul.f32 %v1955_v20, %v2280_v35  ;;  %v1043_v9 = vmul.f32 %v2328_v4, %v2272_v28 }
 0x156   : > { %1730 = vst [vmem:[%s2096_s30 + $0x20] sm:$0xff] %v1362_v12  ;;  %1962 = vtanh.f32 %v1373_v40  ;;  %v1363_v17 = vadd.f32 0.5, %v1361_v14  ;;  %v1374_v18 = vadd.f32 %v1370_v47, %v783_v30  ;;  %v1959_v21 = vpop.eup %1958  ;;  %v904_v29 = vmul.f32 %v1957_v22, %v2280_v35 }
 0x157   : > { %v1961_v31 = vpop.eup %1960  ;;  %v905_v41 = vmul.f32 0.25, %v902_v27  ;;  %v1157_v39 = vmul.f32 0.5, %v1959_v21  ;;  %v1044_v14 = vmul.f32 0.5, %v1042_v7  ;;  %v1045_v16 = vmul.f32 0.5, %v1043_v9 }
 0x158   : > { %1731 = vst [vmem:[%s2096_s30 + $0x28] sm:$0xff] %v1363_v17  ;;  %1964 = vtanh.f32 %v1374_v18  ;;  %v906_v51 = vmul.f32 0.25, %v904_v29  ;;  %v1158_v8 = vmul.f32 0.5, %v1961_v31 }
 0x159   : > { %1966 = vrcp.f32 %v1031_v3  ;;  %v914_v13 = vadd.f32 %v912_v42, %v905_v41  ;;  %v1159_v32 = vadd.f32 0.5, %v1157_v39  ;;  %v1174_v42 = vmul.f32 %v2345_v49, %v2272_v28 }
 0x15a   : > { %1968 = vrcp.f32 %v1032_v24  ;;  %v915_v15 = vadd.f32 %v913_v46, %v906_v51  ;;  %v1160_v53 = vadd.f32 0.5, %v1158_v8 }
 0x15b   : > { %1970 = vtanh.f32 %v1285_v45  ;;  %v1161_v38 = vmul.f32 %v1159_v32, %v2250_v0 }
 0x15c   : > { %1972 = vtanh.f32 %v1286_v37  ;;  %v1162_v59 = vmul.f32 %v1160_v53, %v2250_v0 }
 0x15d   : > { %v1163_v62 = vadd.f32 %v1161_v38, %v2257_v11 }
 0x15e   : > { %v1164_v63 = vadd.f32 %v1162_v59, %v2257_v11 }
 0x163   : > { %v1963_v43 = vpop.eup %1962 }
 0x164   : > { %v1377_v44 = vmul.f32 0.5, %v1963_v43  ;;  %v1386_v48 = vmul.f32 %v1963_v43, %v905_v41  ;;  %v1175_v43 = vmul.f32 %v2350_v50, %v2272_v28 }
 0x165   : > { %v1965_v52 = vpop.eup %1964 }
 0x166   : > { %v1379_v54 = vadd.f32 0.5, %v1377_v44  ;;  %v1390_v55 = vadd.f32 %v1386_v48, %v914_v13  ;;  %v1378_v56 = vmul.f32 0.5, %v1965_v52  ;;  %v1387_v57 = vmul.f32 %v1965_v52, %v906_v51  ;;  %v1967_v60 = vpop.eup %1966 }
 0x167   : > { %v1969_v61 = vpop.eup %1968  ;;  %v1034_v2 = vmul.f32 %v1967_v60, %v2280_v35  ;;  %v1176_v13 = vmul.f32 0.5, %v1174_v42  ;;  %v1177_v48 = vmul.f32 0.5, %v1175_v43  ;;  %v1306_v60 = vmul.f32 %v2367_v23, %v2272_v28 }
 0x168   : > { %1732 = vst [vmem:[%s2096_s30 + $0x30] sm:$0xff] %v1379_v54  ;;  %1974 = vtanh.f32 %v1390_v55  ;;  %v1380_v33 = vadd.f32 0.5, %v1378_v56  ;;  %v1391_v58 = vadd.f32 %v1387_v57, %v915_v15  ;;  %v1971_v26 = vpop.eup %1970  ;;  %v1036_v5 = vmul.f32 %v1969_v61, %v2280_v35 }
 0x169   : > { %v1973_v6 = vpop.eup %1972  ;;  %v1037_v30 = vmul.f32 0.25, %v1034_v2  ;;  %v1289_v10 = vmul.f32 0.5, %v1971_v26  ;;  %v1307_v61 = vmul.f32 %v2372_v25, %v2272_v28  ;;  %v1308_v2 = vmul.f32 0.5, %v1306_v60 }
 0x16a   : > { %1733 = vst [vmem:[%s2096_s30 + $0x38] sm:$0xff] %v1380_v33  ;;  %1976 = vtanh.f32 %v1391_v58  ;;  %v1038_v12 = vmul.f32 0.25, %v1036_v5  ;;  %v1290_v40 = vmul.f32 0.5, %v1973_v6 }
 0x16b   : > { %1978 = vrcp.f32 %v1163_v62  ;;  %v1046_v18 = vadd.f32 %v1044_v14, %v1037_v30  ;;  %v1291_v20 = vadd.f32 0.5, %v1289_v10  ;;  %v1309_v5 = vmul.f32 0.5, %v1307_v61 }
 0x16c   : > { %1980 = vrcp.f32 %v1164_v63  ;;  %v1047_v1 = vadd.f32 %v1045_v16, %v1038_v12  ;;  %v1292_v3 = vadd.f32 0.5, %v1290_v40 }
 0x16d   : > { %v1293_v36 = vmul.f32 %v1291_v20, %v2250_v0 }
 0x16e   : > { %v1294_v45 = vmul.f32 %v1292_v3, %v2250_v0 }
 0x16f   : > { %v1295_v41 = vadd.f32 %v1293_v36, %v2257_v11 }
 0x170   : > { %v1296_v39 = vadd.f32 %v1294_v45, %v2257_v11 }
 0x175   : > { %v1975_v47 = vpop.eup %1974 }
 0x176   : > { %v1394_v17 = vmul.f32 0.5, %v1975_v47  ;;  %v1403_v19 = vmul.f32 %v1975_v47, %v1037_v30 }
 0x177   : > { %v1977_v22 = vpop.eup %1976 }
 0x178   : > { %v1396_v24 = vadd.f32 0.5, %v1394_v17  ;;  %v1407_v27 = vadd.f32 %v1403_v19, %v1046_v18  ;;  %v1395_v4 = vmul.f32 0.5, %v1977_v22  ;;  %v1404_v21 = vmul.f32 %v1977_v22, %v1038_v12  ;;  %v1979_v34 = vpop.eup %1978 }
 0x179   : > { %v1981_v37 = vpop.eup %1980  ;;  %v1166_v51 = vmul.f32 %v1979_v34, %v2280_v35 }
 0x17a   : > { %1734 = vst [vmem:[%s2096_s30 + $0x40] sm:$0xff] %v1396_v24  ;;  %1982 = vtanh.f32 %v1407_v27  ;;  %v1397_v29 = vadd.f32 0.5, %v1395_v4  ;;  %v1408_v31 = vadd.f32 %v1404_v21, %v1047_v1  ;;  %v1168_v8 = vmul.f32 %v1981_v37, %v2280_v35 }
 0x17b   : > { %v1169_v0 = vmul.f32 0.25, %v1166_v51 }
 0x17c   : > { %1735 = vst [vmem:[%s2096_s30 + $0x48] sm:$0xff] %v1397_v29  ;;  %1984 = vtanh.f32 %v1408_v31  ;;  %v1170_v46 = vmul.f32 0.25, %v1168_v8 }
 0x17d   : > { %1986 = vrcp.f32 %v1295_v41  ;;  %v1178_v32 = vadd.f32 %v1176_v13, %v1169_v0 }
 0x17e   : > { %1988 = vrcp.f32 %v1296_v39  ;;  %v1179_v53 = vadd.f32 %v1177_v48, %v1170_v46 }
 0x187   : > { %v1983_v44 = vpop.eup %1982 }
 0x188   : > { %v1411_v11 = vmul.f32 0.5, %v1983_v44  ;;  %v1420_v52 = vmul.f32 %v1983_v44, %v1169_v0 }
 0x189   : > { %v1985_v15 = vpop.eup %1984 }
 0x18a   : > { %v1413_v54 = vadd.f32 0.5, %v1411_v11  ;;  %v1412_v55 = vmul.f32 0.5, %v1985_v15  ;;  %v1424_v49 = vadd.f32 %v1420_v52, %v1178_v32  ;;  %v1421_v56 = vmul.f32 %v1985_v15, %v1170_v46  ;;  %v1987_v33 = vpop.eup %1986 }
 0x18b   : > { %v1989_v58 = vpop.eup %1988  ;;  %v1298_v38 = vmul.f32 %v1987_v33, %v2280_v35 }
 0x18c   : > { %1736 = vst [vmem:[%s2096_s30 + $0x50] sm:$0xff] %v1413_v54  ;;  %v1414_v57 = vadd.f32 0.5, %v1412_v55  ;;  %1990 = vtanh.f32 %v1424_v49  ;;  %v1425_v50 = vadd.f32 %v1421_v56, %v1179_v53  ;;  %v1300_v59 = vmul.f32 %v1989_v58, %v2280_v35 }
 0x18d   : > { %v1301_v62 = vmul.f32 0.25, %v1298_v38 }
 0x18e   : > { %1737 = vst [vmem:[%s2096_s30 + $0x58] sm:$0xff] %v1414_v57  ;;  %1992 = vtanh.f32 %v1425_v50  ;;  %v1302_v63 = vmul.f32 0.25, %v1300_v59 }
 0x18f   : > { %v1310_v7 = vadd.f32 %v1308_v2, %v1301_v62 }
 0x190   : > { %v1311_v10 = vadd.f32 %v1309_v5, %v1302_v63 }
 0x199   : > { %v1991_v26 = vpop.eup %1990 }
 0x19a   : > { %v1428_v6 = vmul.f32 0.5, %v1991_v26  ;;  %v1437_v9 = vmul.f32 %v1991_v26, %v1301_v62 }
 0x19b   : > { %v1993_v30 = vpop.eup %1992 }
 0x19c   : > { %v1430_v12 = vadd.f32 0.5, %v1428_v6  ;;  %v1441_v35 = vadd.f32 %v1437_v9, %v1310_v7  ;;  %v1429_v40 = vmul.f32 0.5, %v1993_v30  ;;  %v1438_v23 = vmul.f32 %v1993_v30, %v1302_v63 }
 0x19e   : > { %1738 = vst [vmem:[%s2096_s30 + $0x60] sm:$0xff] %v1430_v12  ;;  %1994 = vtanh.f32 %v1441_v35  ;;  %v1431_v28 = vadd.f32 0.5, %v1429_v40  ;;  %v1442_v25 = vadd.f32 %v1438_v23, %v1311_v10 }
 0x1a0   : > { %1739 = vst [vmem:[%s2096_s30 + $0x68] sm:$0xff] %v1431_v28  ;;  %1996 = vtanh.f32 %v1442_v25 }
 0x1ab   : > { %v1995_v14 = vpop.eup %1994 }
 0x1ac   : > { %v1445_v47 = vmul.f32 0.5, %v1995_v14  ;;  %1452 = vst [vmem:[#allocation2] sm:$0xff] %v1995_v14 }
 0x1ad   : > { %v1997_v16 = vpop.eup %1996 }
 0x1ae   : > { %v1447_v17 = vadd.f32 0.5, %v1445_v47  ;;  %v1446_v18 = vmul.f32 0.5, %v1997_v16  ;;  %1453 = vst [vmem:[#allocation2 + $0x8] sm:$0xff] %v1997_v16 }
 0x1b0   : > { %1740 = vst [vmem:[%s2096_s30 + $0x70] sm:$0xff] %v1447_v17  ;;  %v1448_v19 = vadd.f32 0.5, %v1446_v18 }
 0x1b2   : > { %1741 = vst [vmem:[%s2096_s30 + $0x78] sm:$0xff] %v1448_v19 }
 0x1b3 PF: > { %s13_s16 = sadd.s32 1, %s2036_s16   ;;  %s2437_s12 = smov %s2028_s14 }
 0x1b4   : > { %p10_p8 = scmp.ge.s32.totalorder %s13_s16, 6   ;;  %s2438_s13 = smov %s2032_s15 }
 0x1b5   : > { %s2439_s14 = smov %s2442_s17  ;;  %s2440_s15 = smov %s2446_s18 }
 0x1b6   :  { %12 = sbr.rel (!%p10_p8) target bundleno = 3 (0x3), region = 98 }

</bundles_post_ra>
